<compile_context>
chip_gen: v6e
topology: v6e:2x2x1
jax: 0.10.0
libtpu: 0.0.40
codegen_flags: <defaults>
</compile_context>

<pallas_src>
import functools

import jax
import jax.numpy as jnp
from jax.experimental import pallas as pl
from jax.experimental.pallas import tpu as pltpu

H1 = 400   # obs_network hidden width
H2 = 300   # out_network hidden width
LANE = 128


def _round_up(n, m):
    return ((n + m - 1) // m) * m


def _pad2d(a, rows, cols):
    return jnp.pad(a, ((0, rows - a.shape[0]), (0, cols - a.shape[1])))


def ddpg_critic_kernel(x_ref, act_ref, w1_ref, b1_ref, w2o_ref, w2a_ref,
                       b2_ref, w3_ref, b3_ref, q_ref):
    # obs_network: Linear(n_state -> 400) + ReLU (f32 accumulate, f32 bias/ReLU).
    h1 = jnp.dot(x_ref[...], w1_ref[...], preferred_element_type=jnp.float32)
    h1 = jnp.maximum(h1 + b1_ref[...], 0.0)
    # out_network layer 1: Linear(400 + A -> 300) + ReLU; the concat is replaced
    # by the mathematically identical split matmul h1 @ W2_obs + a @ W2_act.
    h2 = jnp.dot(h1.astype(w2o_ref.dtype), w2o_ref[...],
                 preferred_element_type=jnp.float32)
    h2 = h2 + jnp.dot(act_ref[...], w2a_ref[...],
                      preferred_element_type=jnp.float32)
    h2 = jnp.maximum(h2 + b2_ref[...], 0.0)
    # out_network layer 2: Linear(300 -> 1), padded to a lane-dense 128-wide slab.
    q = jnp.dot(h2.astype(w3_ref.dtype), w3_ref[...],
                preferred_element_type=jnp.float32)
    q_ref[...] = q + b3_ref[...]


def ddpg_critic_forward(x, actions, params, *, batch_tile=512,
                        compute_dtype=jnp.float32):
    """x: (B, n_state) f32, actions: (B, n_actions) f32 -> Q: (B, 1) f32."""
    w1, b1, w2, b2, w3, b3 = params
    B, D = x.shape
    A = actions.shape[1]
    assert w1.shape == (D, H1) and w2.shape == (H1 + A, H2) and w3.shape == (H2, 1)

    # Lane-dense padded dimensions.
    Dp = _round_up(D, LANE)
    Ap = _round_up(A, LANE)
    H1p = _round_up(H1, LANE)   # 512
    H2p = _round_up(H2, LANE)   # 384
    OUTP = LANE                 # Q written into a 128-wide slab; column 0 is real.

    # Batch tiling: tile is a multiple of 8 (sublane); batch padded up to the grid.
    bt = min(batch_tile, _round_up(B, 8))
    Bp = _round_up(B, bt)
    grid = (Bp // bt,)

    cdt = jnp.dtype(compute_dtype)

    # Zero-padded (in, out)-layout operands: MXU inputs in compute_dtype,
    # biases kept f32 (added to the f32 accumulator inside the kernel).
    xp = _pad2d(x, Bp, Dp).astype(cdt)
    ap = _pad2d(actions, Bp, Ap).astype(cdt)
    w1p = _pad2d(w1, Dp, H1p).astype(cdt)
    b1p = _pad2d(b1.reshape(1, H1), 1, H1p).astype(jnp.float32)
    w2o = _pad2d(w2[:H1], H1p, H2p).astype(cdt)
    w2a = _pad2d(w2[H1:], Ap, H2p).astype(cdt)
    b2p = _pad2d(b2.reshape(1, H2), 1, H2p).astype(jnp.float32)
    w3p = _pad2d(w3, H2p, OUTP).astype(cdt)
    b3p = _pad2d(b3.reshape(1, 1), 1, OUTP).astype(jnp.float32)

    in_specs = [
        pl.BlockSpec((bt, Dp), lambda i: (i, 0)),     # x tile   (streamed)
        pl.BlockSpec((bt, Ap), lambda i: (i, 0)),     # actions  (streamed)
        pl.BlockSpec((Dp, H1p), lambda i: (0, 0)),    # W1       (resident)
        pl.BlockSpec((1, H1p), lambda i: (0, 0)),     # b1
        pl.BlockSpec((H1p, H2p), lambda i: (0, 0)),   # W2_obs
        pl.BlockSpec((Ap, H2p), lambda i: (0, 0)),    # W2_act
        pl.BlockSpec((1, H2p), lambda i: (0, 0)),     # b2
        pl.BlockSpec((H2p, OUTP), lambda i: (0, 0)),  # W3 (padded to 128 cols)
        pl.BlockSpec((1, OUTP), lambda i: (0, 0)),    # b3
    ]
    out_specs = pl.BlockSpec((bt, OUTP), lambda i: (i, 0))
    out_shape = jax.ShapeDtypeStruct((Bp, OUTP), jnp.float32)

    itemsize = cdt.itemsize
    weight_bytes = (sum(int(a.size) * itemsize for a in (w1p, w2o, w2a, w3p))
                    + sum(int(a.size) * 4 for a in (b1p, b2p, b3p)))
    cost = pl.CostEstimate(
        flops=2 * Bp * (Dp * H1p + H1p * H2p + Ap * H2p + H2p * OUTP),
        transcendentals=0,
        bytes_accessed=(int(xp.size) + int(ap.size)) * itemsize
        + weight_bytes + Bp * OUTP * 4,
    )

    q_pad = pl.pallas_call(
        ddpg_critic_kernel,
        grid_spec=pltpu.PrefetchScalarGridSpec(
            num_scalar_prefetch=0,
            grid=grid,
            in_specs=in_specs,
            out_specs=out_specs,
        ),
        out_shape=out_shape,
        compiler_params=pltpu.CompilerParams(
            dimension_semantics=("parallel",),
        ),
        cost_estimate=cost,
    )(xp, ap, w1p, b1p, w2o, w2a, b2p, w3p, b3p)

    return q_pad[:B, :1]


def init_params(key, n_state, n_actions):
    """PyTorch-Linear-style init; weights stored (in, out) so y = x @ W + b."""
    ks = jax.random.split(key, 6)
    s1 = 1.0 / jnp.sqrt(n_state)
    s2 = 1.0 / jnp.sqrt(H1 + n_actions)
    s3 = 1.0 / jnp.sqrt(H2)
    w1 = jax.random.uniform(ks[0], (n_state, H1), jnp.float32, -s1, s1)
    b1 = jax.random.uniform(ks[1], (H1,), jnp.float32, -s1, s1)
    w2 = jax.random.uniform(ks[2], (H1 + n_actions, H2), jnp.float32, -s2, s2)
    b2 = jax.random.uniform(ks[3], (H2,), jnp.float32, -s2, s2)
    w3 = jax.random.uniform(ks[4], (H2, 1), jnp.float32, -s3, s3)
    b3 = jax.random.uniform(ks[5], (1,), jnp.float32, -s3, s3)
    return (w1, b1, w2, b2, w3, b3)


def reference_forward(x, actions, params):
    w1, b1, w2, b2, w3, b3 = params
    mm = functools.partial(jnp.matmul, precision=jax.lax.Precision.HIGHEST)
    obs = jnp.maximum(mm(x, w1) + b1, 0.0)
    z = jnp.concatenate([obs, actions], axis=1)
    h = jnp.maximum(mm(z, w2) + b2, 0.0)
    return mm(h, w3) + b3


if __name__ == "__main__":
    key = jax.random.PRNGKey(0)
    kx, ka, kp = jax.random.split(key, 3)

    batch = 8
    n_state = 16
    n_actions = 4

    x = jax.random.normal(kx, (batch, n_state), jnp.float32)
    actions = jax.random.uniform(ka, (batch, n_actions), jnp.float32, -1.0, 1.0)
    params = init_params(kp, n_state, n_actions)

    q_ref = reference_forward(x, actions, params)

    # f32 path.
    q = jax.block_until_ready(
        ddpg_critic_forward(x, actions, params, compute_dtype=jnp.float32))
    assert q.shape == (batch, 1)
    assert jnp.allclose(q, q_ref, atol=1e-3, rtol=1e-3)

    # multi-step grid + ragged-batch path (batch not a multiple of the tile).
    batch2 = 20
    x2 = jax.random.normal(kx, (batch2, n_state), jnp.float32)
    actions2 = jax.random.uniform(ka, (batch2, n_actions), jnp.float32, -1.0, 1.0)
    q2 = jax.block_until_ready(
        ddpg_critic_forward(x2, actions2, params, batch_tile=8))
    assert q2.shape == (batch2, 1)
    assert jnp.allclose(q2, reference_forward(x2, actions2, params),
                        atol=1e-3, rtol=1e-3)

    # bf16 MXU-input path (f32 accumulation) — looser tolerance vs f32 reference.
    q_bf16 = jax.block_until_ready(
        ddpg_critic_forward(x, actions, params, compute_dtype=jnp.bfloat16))
    assert q_bf16.shape == (batch, 1)
    assert jnp.allclose(q_bf16, q_ref, atol=5e-2, rtol=5e-2)

    print("KERNEL_OK")
</pallas_src>

<mosaic_0001>
module attributes {stable_mosaic.version = 11 : i64} {
  func.func @ddpg_critic_kernel(%arg0: i32, %arg1: memref<8x128xf32, #tpu.memory_space<vmem>>, %arg2: memref<8x128xf32, #tpu.memory_space<vmem>>, %arg3: memref<128x512xf32, #tpu.memory_space<vmem>>, %arg4: memref<1x512xf32, #tpu.memory_space<vmem>>, %arg5: memref<512x384xf32, #tpu.memory_space<vmem>>, %arg6: memref<128x384xf32, #tpu.memory_space<vmem>>, %arg7: memref<1x384xf32, #tpu.memory_space<vmem>>, %arg8: memref<384x128xf32, #tpu.memory_space<vmem>>, %arg9: memref<1x128xf32, #tpu.memory_space<vmem>>, %arg10: memref<8x128xf32, #tpu.memory_space<vmem>>) attributes {dimension_semantics = [#tpu.dimension_semantics<parallel>], iteration_bounds = array<i64: 1>, scalar_prefetch = 0 : i64, scratch_operands = 0 : i64, tpu.core_type = #tpu.core_type<tc>, window_params = [{transform_indices = @transform_0, window_bounds = array<i64: 8, 128>}, {transform_indices = @transform_1, window_bounds = array<i64: 8, 128>}, {pipeline_mode = #tpu.pipeline_mode<synchronous>, transform_indices = @transform_2, window_bounds = array<i64: 128, 512>}, {pipeline_mode = #tpu.pipeline_mode<synchronous>, transform_indices = @transform_3, window_bounds = array<i64: 1, 512>}, {pipeline_mode = #tpu.pipeline_mode<synchronous>, transform_indices = @transform_4, window_bounds = array<i64: 512, 384>}, {pipeline_mode = #tpu.pipeline_mode<synchronous>, transform_indices = @transform_5, window_bounds = array<i64: 128, 384>}, {pipeline_mode = #tpu.pipeline_mode<synchronous>, transform_indices = @transform_6, window_bounds = array<i64: 1, 384>}, {pipeline_mode = #tpu.pipeline_mode<synchronous>, transform_indices = @transform_7, window_bounds = array<i64: 384, 128>}, {pipeline_mode = #tpu.pipeline_mode<synchronous>, transform_indices = @transform_8, window_bounds = array<i64: 1, 128>}, {transform_indices = @transform_9, window_bounds = array<i64: 8, 128>}]} {
    %c0 = arith.constant 0 : index
    %c0_0 = arith.constant 0 : index
    %0 = vector.load %arg1[%c0, %c0_0] : memref<8x128xf32, #tpu.memory_space<vmem>>, vector<8x128xf32>
    %c0_1 = arith.constant 0 : index
    %c0_2 = arith.constant 0 : index
    %1 = vector.load %arg3[%c0_1, %c0_2] : memref<128x512xf32, #tpu.memory_space<vmem>>, vector<128x512xf32>
    %cst = arith.constant dense<0.000000e+00> : vector<8x512xf32>
    %2 = tpu.matmul %0, %1, %cst {dimension_numbers = #tpu.dot_dimension_numbers<[1], [0], [0], [1], [0, 0, 1, 1], [], []>} : vector<8x128xf32>, vector<128x512xf32>, vector<8x512xf32> -> vector<8x512xf32>
    %c0_3 = arith.constant 0 : index
    %c0_4 = arith.constant 0 : index
    %3 = vector.load %arg4[%c0_3, %c0_4] : memref<1x512xf32, #tpu.memory_space<vmem>>, vector<1x512xf32>
    %4 = vector.broadcast %3 : vector<1x512xf32> to vector<8x512xf32>
    %5 = arith.addf %2, %4 : vector<8x512xf32>
    %cst_5 = arith.constant 0.000000e+00 : f32
    %6 = vector.broadcast %cst_5 : f32 to vector<8x512xf32>
    %7 = arith.maximumf %5, %6 : vector<8x512xf32>
    %c0_6 = arith.constant 0 : index
    %c0_7 = arith.constant 0 : index
    %8 = vector.load %arg5[%c0_6, %c0_7] : memref<512x384xf32, #tpu.memory_space<vmem>>, vector<512x384xf32>
    %cst_8 = arith.constant dense<0.000000e+00> : vector<8x384xf32>
    %9 = tpu.matmul %7, %8, %cst_8 {dimension_numbers = #tpu.dot_dimension_numbers<[1], [0], [0], [1], [0, 0, 1, 1], [], []>} : vector<8x512xf32>, vector<512x384xf32>, vector<8x384xf32> -> vector<8x384xf32>
    %c0_9 = arith.constant 0 : index
    %c0_10 = arith.constant 0 : index
    %10 = vector.load %arg2[%c0_9, %c0_10] : memref<8x128xf32, #tpu.memory_space<vmem>>, vector<8x128xf32>
    %c0_11 = arith.constant 0 : index
    %c0_12 = arith.constant 0 : index
    %11 = vector.load %arg6[%c0_11, %c0_12] : memref<128x384xf32, #tpu.memory_space<vmem>>, vector<128x384xf32>
    %cst_13 = arith.constant dense<0.000000e+00> : vector<8x384xf32>
    %12 = tpu.matmul %10, %11, %cst_13 {dimension_numbers = #tpu.dot_dimension_numbers<[1], [0], [0], [1], [0, 0, 1, 1], [], []>} : vector<8x128xf32>, vector<128x384xf32>, vector<8x384xf32> -> vector<8x384xf32>
    %13 = arith.addf %9, %12 : vector<8x384xf32>
    %c0_14 = arith.constant 0 : index
    %c0_15 = arith.constant 0 : index
    %14 = vector.load %arg7[%c0_14, %c0_15] : memref<1x384xf32, #tpu.memory_space<vmem>>, vector<1x384xf32>
    %15 = vector.broadcast %14 : vector<1x384xf32> to vector<8x384xf32>
    %16 = arith.addf %13, %15 : vector<8x384xf32>
    %cst_16 = arith.constant 0.000000e+00 : f32
    %17 = vector.broadcast %cst_16 : f32 to vector<8x384xf32>
    %18 = arith.maximumf %16, %17 : vector<8x384xf32>
    %c0_17 = arith.constant 0 : index
    %c0_18 = arith.constant 0 : index
    %19 = vector.load %arg8[%c0_17, %c0_18] : memref<384x128xf32, #tpu.memory_space<vmem>>, vector<384x128xf32>
    %cst_19 = arith.constant dense<0.000000e+00> : vector<8x128xf32>
    %20 = tpu.matmul %18, %19, %cst_19 {dimension_numbers = #tpu.dot_dimension_numbers<[1], [0], [0], [1], [0, 0, 1, 1], [], []>} : vector<8x384xf32>, vector<384x128xf32>, vector<8x128xf32> -> vector<8x128xf32>
    %c0_20 = arith.constant 0 : index
    %c0_21 = arith.constant 0 : index
    %21 = vector.load %arg9[%c0_20, %c0_21] : memref<1x128xf32, #tpu.memory_space<vmem>>, vector<1x128xf32>
    %22 = vector.broadcast %21 : vector<1x128xf32> to vector<8x128xf32>
    %23 = arith.addf %20, %22 : vector<8x128xf32>
    %c0_22 = arith.constant 0 : index
    %c0_23 = arith.constant 0 : index
    %24 = vector.load %arg10[%c0_22, %c0_23] : memref<8x128xf32, #tpu.memory_space<vmem>>, vector<8x128xf32>
    tpu.vector_store %arg10[%c0_22, %c0_23], %23 {strides = array<i32>} : memref<8x128xf32, #tpu.memory_space<vmem>>, vector<8x128xf32>,
    return
  }
  func.func @transform_0(%arg0: i32) -> (i32, i32) {
    %c0_i32 = arith.constant 0 : i32
    %c0_i32_0 = arith.constant 0 : i32
    return %arg0, %c0_i32 : i32, i32
  }
  func.func @transform_1(%arg0: i32) -> (i32, i32) {
    %c0_i32 = arith.constant 0 : i32
    %c0_i32_0 = arith.constant 0 : i32
    return %arg0, %c0_i32 : i32, i32
  }
  func.func @transform_2(%arg0: i32) -> (i32, i32) {
    %c0_i32 = arith.constant 0 : i32
    %c0_i32_0 = arith.constant 0 : i32
    %c0_i32_1 = arith.constant 0 : i32
    return %c0_i32, %c0_i32_0 : i32, i32
  }
  func.func @transform_3(%arg0: i32) -> (i32, i32) {
    %c0_i32 = arith.constant 0 : i32
    %c0_i32_0 = arith.constant 0 : i32
    %c0_i32_1 = arith.constant 0 : i32
    return %c0_i32, %c0_i32_0 : i32, i32
  }
  func.func @transform_4(%arg0: i32) -> (i32, i32) {
    %c0_i32 = arith.constant 0 : i32
    %c0_i32_0 = arith.constant 0 : i32
    %c0_i32_1 = arith.constant 0 : i32
    return %c0_i32, %c0_i32_0 : i32, i32
  }
  func.func @transform_5(%arg0: i32) -> (i32, i32) {
    %c0_i32 = arith.constant 0 : i32
    %c0_i32_0 = arith.constant 0 : i32
    %c0_i32_1 = arith.constant 0 : i32
    return %c0_i32, %c0_i32_0 : i32, i32
  }
  func.func @transform_6(%arg0: i32) -> (i32, i32) {
    %c0_i32 = arith.constant 0 : i32
    %c0_i32_0 = arith.constant 0 : i32
    %c0_i32_1 = arith.constant 0 : i32
    return %c0_i32, %c0_i32_0 : i32, i32
  }
  func.func @transform_7(%arg0: i32) -> (i32, i32) {
    %c0_i32 = arith.constant 0 : i32
    %c0_i32_0 = arith.constant 0 : i32
    %c0_i32_1 = arith.constant 0 : i32
    return %c0_i32, %c0_i32_0 : i32, i32
  }
  func.func @transform_8(%arg0: i32) -> (i32, i32) {
    %c0_i32 = arith.constant 0 : i32
    %c0_i32_0 = arith.constant 0 : i32
    %c0_i32_1 = arith.constant 0 : i32
    return %c0_i32, %c0_i32_0 : i32, i32
  }
  func.func @transform_9(%arg0: i32) -> (i32, i32) {
    %c0_i32 = arith.constant 0 : i32
    %c0_i32_0 = arith.constant 0 : i32
    return %arg0, %c0_i32 : i32, i32
  }
}

</mosaic_0001>

<bundles_post_ra>
// kernel: tpu_custom_call.1
= control target key start
LH: loop header
LB: loop body
LE: loop exit
PB: predicated region body
PF: predicated region fallthrough
CT: control target
= control target key end

     0   :  { %14 = vsyncpa [#allocation3], 0  ;;  %s1795_s0 = inlined_call_operand.hbm [shape: f32[8,128], index: 0, kind: input, shape index: {}]   ;;  %s1796_s1 = inlined_call_operand.hbm [shape: f32[8,128], index: 1, kind: input, shape index: {}]   ;;  %s1797_s2 = inlined_call_operand.hbm [shape: f32[128,512], index: 2, kind: input, shape index: {}]   ;;  %s1798_s3 = inlined_call_operand.vmem [shape: f32[1,512], index: 3, kind: input, shape index: {}]   ;;  %s1799_s4 = inlined_call_operand.hbm [shape: f32[512,384], index: 4, kind: input, shape index: {}]   ;;  %s1800_s5 = inlined_call_operand.hbm [shape: f32[128,384], index: 5, kind: input, shape index: {}]   ;;  %s1801_s6 = inlined_call_operand.vmem [shape: f32[1,384], index: 6, kind: input, shape index: {}]   ;;  %s1802_s7 = inlined_call_operand.hbm [shape: f32[384,128], index: 7, kind: input, shape index: {}]   ;;  %s1803_s8 = inlined_call_operand.vmem [shape: f32[1,128], index: 8, kind: input, shape index: {}]   ;;  %s1804_s9 = inlined_call_operand.hbm [shape: f32[8,128], index: 9, kind: output, shape index: {}]  }
   0x1   :  { %15 = vsyncpa [#allocation6], 0 }
   0x2   :  { %16 = vsyncpa [#allocation9], 0 }
   0x3   :  { %17 = vsyncpa [#allocation12], 0 }
   0x4   :  { %18 = vsyncpa [#allocation4], 0  ;;  %s1620_s30 = smov [#allocation5]   ;;  %s1621_s11 = smov [#allocation8]  }
   0x5   :  { %s35_s10 = sshll.u32 %s1620_s30, 4  ;;  %s58_s12 = sshll.u32 %s1621_s11, 4  ;;  %s36_s10 = int_to_ptr.vmem [resolvable:$true] %s35_s10  ;;  %s59_s12 = int_to_ptr.vmem [resolvable:$true] %s58_s12 }
   0x6   :  { %s1478_s13 = scalar_lea.vmem %s36_s10, 128  ;;  %p1483_p1 = scmp.lt.s32.totalorder %s36_s10, %s36_s10 }
   0x7   :  { %p1479_p0 = scmp.ne.s32.totalorder %s36_s10, %s1478_s13  ;;  %p1484_p2 = scmp.lt.s32.totalorder %s1478_s13, %s1478_s13 }
   0x9   :  { %p1485_p3 = por %p1484_p2, %p1483_p1 }
   0xb   :  { %p1486_p4 = pnand %p1485_p3, %p1479_p0 }
   0xd   :  { %1489 = shalt.err (!%p1486_p4)
}
   0xe   :  { %38 = dma.hbm_to_vmem [thread:$0]  %s1796_s1, 128, %s36_s10, [#allocation6]  }
   0xf   :  { %s1498_s16 = scalar_lea.vmem %s59_s12, 24576  ;;  %p1503_p6 = scmp.lt.s32.totalorder %s59_s12, %s59_s12 }
  0x10   :  { %p1499_p5 = scmp.ne.s32.totalorder %s59_s12, %s1498_s16  ;;  %p1504_p7 = scmp.lt.s32.totalorder %s1498_s16, %s1498_s16 }
  0x12   :  { %p1505_p8 = por %p1504_p7, %p1503_p6 }
  0x14   :  { %p1506_p9 = pnand %p1505_p8, %p1499_p5 }
  0x16   :  { %1509 = shalt.err (!%p1506_p9)
}
  0x17   :  { %s1622_s17 = smov 384   ;;  %s1623_s18 = smov 24  }
  0x18   :  { %64 = dma.hbm_to_vmem [thread:$0]  %s1799_s4, 24576, %s59_s12, [#allocation9], %s1622_s17, %s1622_s17, %s1623_s18  }
  0x19   :  { %s1624_s21 = smov [#allocation2]   ;;  %s1625_s23 = smov [#allocation7]  }
  0x1a   :  { %s25_s22 = sshll.u32 %s1624_s21, 4  ;;  %s44_s1 = sshll.u32 %s1625_s23, 4  ;;  %s26_s22 = int_to_ptr.vmem [resolvable:$true] %s25_s22  ;;  %s45_s1 = int_to_ptr.vmem [resolvable:$true] %s44_s1 }
  0x1b   :  { %s1518_s24 = scalar_lea.vmem %s26_s22, 128  ;;  %p1523_p11 = scmp.lt.s32.totalorder %s26_s22, %s26_s22 }
  0x1c   :  { %p1519_p10 = scmp.ne.s32.totalorder %s26_s22, %s1518_s24  ;;  %p1524_p12 = scmp.lt.s32.totalorder %s1518_s24, %s1518_s24 }
  0x1e   :  { %p1525_p13 = por %p1524_p12, %p1523_p11 }
  0x20   :  { %p1526_p0 = pnand %p1525_p13, %p1519_p10 }
  0x22   :  { %1529 = shalt.err (!%p1526_p0)
}
  0x23   :  { %28 = dma.hbm_to_vmem [thread:$0]  %s1795_s0, 128, %s26_s22, [#allocation3]  }
  0x24   :  { %s1538_s27 = scalar_lea.vmem %s45_s1, 8192  ;;  %p1543_p2 = scmp.lt.s32.totalorder %s45_s1, %s45_s1 }
  0x25   :  { %p1539_p1 = scmp.ne.s32.totalorder %s45_s1, %s1538_s27  ;;  %p1544_p3 = scmp.lt.s32.totalorder %s1538_s27, %s1538_s27 }
  0x27   :  { %p1545_p4 = por %p1544_p3, %p1543_p2 }
  0x29   :  { %p1546_p5 = pnand %p1545_p4, %p1539_p1 }
  0x2b   :  { %1549 = shalt.err (!%p1546_p5)
}
  0x2c   :  { %s1626_s4 = smov 512   ;;  %s1627_s28 = smov 32  }
  0x2d   :  { %50 = dma.hbm_to_vmem [thread:$0]  %s1797_s2, 8192, %s45_s1, [#allocation6], %s1626_s4, %s1626_s4, %s1627_s28  }
  0x2e   :  { %s1628_s10 = smov [#allocation10]   ;;  %s1629_s12 = smov [#allocation11]  }
  0x2f   :  { %s70_s11 = sshll.u32 %s1628_s10, 4  ;;  %s84_s13 = sshll.u32 %s1629_s12, 4  ;;  %s71_s11 = int_to_ptr.vmem [resolvable:$true] %s70_s11  ;;  %s85_s13 = int_to_ptr.vmem [resolvable:$true] %s84_s13 }
  0x30   :  { %s1558_s0 = scalar_lea.vmem %s71_s11, 6144  ;;  %p1563_p7 = scmp.lt.s32.totalorder %s71_s11, %s71_s11 }
  0x31   :  { %p1559_p6 = scmp.ne.s32.totalorder %s71_s11, %s1558_s0  ;;  %p1564_p8 = scmp.lt.s32.totalorder %s1558_s0, %s1558_s0 }
  0x33   :  { %p1565_p9 = por %p1564_p8, %p1563_p7 }
  0x35   :  { %p1566_p10 = pnand %p1565_p9, %p1559_p6 }
  0x37   :  { %1569 = shalt.err (!%p1566_p10)
}
  0x38   :  { %76 = dma.hbm_to_vmem [thread:$0]  %s1800_s5, 6144, %s71_s11, [#allocation9], %s1622_s17, %s1622_s17, %s1623_s18  }
  0x39   :  { %s1578_s2 = scalar_lea.vmem %s85_s13, 6144  ;;  %p1583_p12 = scmp.lt.s32.totalorder %s85_s13, %s85_s13 }
  0x3a   :  { %p1579_p11 = scmp.ne.s32.totalorder %s85_s13, %s1578_s2  ;;  %p1584_p13 = scmp.lt.s32.totalorder %s1578_s2, %s1578_s2 }
  0x3c   :  { %p1585_p0 = por %p1584_p13, %p1583_p12 }
  0x3e   :  { %p1586_p1 = pnand %p1585_p0, %p1579_p11 }
  0x40   :  { %1589 = shalt.err (!%p1586_p1)
}
  0x41   :  { %s1630_s16 = smov 128   ;;  %s1631_s19 = smov 8  }
  0x42   :  { %90 = dma.hbm_to_vmem [thread:$0]  %s1802_s7, 6144, %s85_s13, [#allocation12], %s1630_s16, %s1630_s16, %s1631_s19  }
  0x43   :  { %1610 = dma.done.wait [#allocation3], 128  }
  0x44   :  { %1611 = vsyncadd [#allocation3], 4294967168 }
  0x45   :  { %1612 = dma.done.wait [#allocation6], 8320  }
  0x46   :  { %1613 = vsyncadd [#allocation6], 4294958976 }
  0x47   :  { %1614 = dma.done.wait [#allocation9], 30720  }
  0x48   :  { %1615 = vsyncadd [#allocation9], 4294936576 }
  0x49   :  { %1616 = dma.done.wait [#allocation12], 6144  }
  0x4a   :  { %1617 = vsyncadd [#allocation12], 4294961152  ;;  %v1632_v0 = vmov 0.0   ;;  %v173_v1 = vld [vmem:[#allocation7 + $0x1e8] sm:$0xff]  ;;  %v175_v2 = vld [vmem:[#allocation7 + $0x1f8] sm:$0xff]  ;;  %vm1633_vm0 = vmmov 0  }
  0x4b   :  { %262 = vmatprep.mubr.f32.mxu0 %v1632_v0  ;;  %333 = vmatprep.mubr.f32.mxu1 %v1632_v0  ;;  %v172_v3 = vld [vmem:[#allocation7 + $0x1e0] sm:$0xff]  ;;  %v174_v4 = vld [vmem:[#allocation7 + $0x1f0] sm:$0xff]  ;;  %v169_v5 = vld [vmem:[#allocation7 + $0x1c8] sm:$0xff]  ;;  %s1634_s22 = smov [#allocation13]  }
  0x4c   :  { %198 = vmatprep.subr.mxu0 %v173_v1  ;;  %269 = vmatprep.subr.mxu1 %v175_v2  ;;  %v171_v6 = vld [vmem:[#allocation7 + $0x1d8] sm:$0xff]  ;;  %v168_v7 = vld [vmem:[#allocation7 + $0x1c0] sm:$0xff]  ;;  %v170_v8 = vld [vmem:[#allocation7 + $0x1d0] sm:$0xff]  ;;  %s1233_s23 = sshll.u32 %s1634_s22, 4  ;;  %s1234_s23 = int_to_ptr.vmem [resolvable:$true] %s1233_s23 }
  0x4d   :  { %199 = vmatpush1.msra.mxu0 %v172_v3  ;;  %270 = vmatpush1.msra.mxu1 %v174_v4  ;;  %v165_v9 = vld [vmem:[#allocation7 + $0x1a8] sm:$0xff]  ;;  %v167_v10 = vld [vmem:[#allocation7 + $0x1b8] sm:$0xff]  ;;  %v164_v11 = vld [vmem:[#allocation7 + $0x1a0] sm:$0xff]  ;;  %s1590_s1 = scalar_lea.vmem %s1234_s23, 128  ;;  %p1595_p3 = scmp.lt.s32.totalorder %s1234_s23, %s1234_s23 }
  0x4e   :  { %200 = vmatprep.subr.mxu0 %v169_v5  ;;  %271 = vmatprep.subr.mxu1 %v171_v6  ;;  %v166_v12 = vld [vmem:[#allocation7 + $0x1b0] sm:$0xff]  ;;  %v161_v13 = vld [vmem:[#allocation7 + $0x188] sm:$0xff]  ;;  %v163_v14 = vld [vmem:[#allocation7 + $0x198] sm:$0xff]  ;;  %p1591_p2 = scmp.ne.s32.totalorder %s1234_s23, %s1590_s1  ;;  %p1596_p4 = scmp.lt.s32.totalorder %s1590_s1, %s1590_s1 }
  0x4f   :  { %201 = vmatpush1.msra.mxu0 %v168_v7  ;;  %272 = vmatpush1.msra.mxu1 %v170_v8  ;;  %v160_v15 = vld [vmem:[#allocation7 + $0x180] sm:$0xff]  ;;  %v162_v16 = vld [vmem:[#allocation7 + $0x190] sm:$0xff]  ;;  %v157_v17 = vld [vmem:[#allocation7 + $0x168] sm:$0xff] }
  0x50   :  { %202 = vmatprep.subr.mxu0 %v165_v9  ;;  %273 = vmatprep.subr.mxu1 %v167_v10  ;;  %v159_v18 = vld [vmem:[#allocation7 + $0x178] sm:$0xff]  ;;  %v156_v19 = vld [vmem:[#allocation7 + $0x160] sm:$0xff]  ;;  %v158_v20 = vld [vmem:[#allocation7 + $0x170] sm:$0xff]  ;;  %p1597_p5 = por %p1596_p4, %p1595_p3 }
  0x51   :  { %203 = vmatpush1.msra.mxu0 %v164_v11  ;;  %274 = vmatpush1.msra.mxu1 %v166_v12  ;;  %v153_v21 = vld [vmem:[#allocation7 + $0x148] sm:$0xff]  ;;  %v155_v22 = vld [vmem:[#allocation7 + $0x158] sm:$0xff]  ;;  %v152_v23 = vld [vmem:[#allocation7 + $0x140] sm:$0xff] }
  0x52   :  { %204 = vmatprep.subr.mxu0 %v161_v13  ;;  %275 = vmatprep.subr.mxu1 %v163_v14  ;;  %v154_v24 = vld [vmem:[#allocation7 + $0x150] sm:$0xff]  ;;  %v149_v25 = vld [vmem:[#allocation7 + $0x128] sm:$0xff]  ;;  %v151_v26 = vld [vmem:[#allocation7 + $0x138] sm:$0xff]  ;;  %p1598_p6 = pnand %p1597_p5, %p1591_p2 }
  0x53   :  { %205 = vmatpush1.msra.mxu0 %v160_v15  ;;  %276 = vmatpush1.msra.mxu1 %v162_v16  ;;  %v148_v27 = vld [vmem:[#allocation7 + $0x120] sm:$0xff]  ;;  %v150_v28 = vld [vmem:[#allocation7 + $0x130] sm:$0xff]  ;;  %v145_v29 = vld [vmem:[#allocation7 + $0x108] sm:$0xff] }
  0x54   :  { %206 = vmatprep.subr.mxu0 %v157_v17  ;;  %277 = vmatprep.subr.mxu1 %v159_v18  ;;  %v147_v30 = vld [vmem:[#allocation7 + $0x118] sm:$0xff]  ;;  %v144_v31 = vld [vmem:[#allocation7 + $0x100] sm:$0xff]  ;;  %v146_v32 = vld [vmem:[#allocation7 + $0x110] sm:$0xff] }
  0x55   :  { %207 = vmatpush1.msra.mxu0 %v156_v19  ;;  %278 = vmatpush1.msra.mxu1 %v158_v20  ;;  %v141_v33 = vld [vmem:[#allocation7 + $0xe8] sm:$0xff]  ;;  %v143_v34 = vld [vmem:[#allocation7 + $0xf8] sm:$0xff]  ;;  %v140_v35 = vld [vmem:[#allocation7 + $0xe0] sm:$0xff] }
  0x56   :  { %208 = vmatprep.subr.mxu0 %v153_v21  ;;  %279 = vmatprep.subr.mxu1 %v155_v22  ;;  %v142_v36 = vld [vmem:[#allocation7 + $0xf0] sm:$0xff]  ;;  %v137_v37 = vld [vmem:[#allocation7 + $0xc8] sm:$0xff]  ;;  %v139_v38 = vld [vmem:[#allocation7 + $0xd8] sm:$0xff] }
  0x57   :  { %209 = vmatpush1.msra.mxu0 %v152_v23  ;;  %280 = vmatpush1.msra.mxu1 %v154_v24  ;;  %v136_v39 = vld [vmem:[#allocation7 + $0xc0] sm:$0xff]  ;;  %v138_v40 = vld [vmem:[#allocation7 + $0xd0] sm:$0xff]  ;;  %v133_v41 = vld [vmem:[#allocation7 + $0xa8] sm:$0xff] }
  0x58   :  { %210 = vmatprep.subr.mxu0 %v149_v25  ;;  %281 = vmatprep.subr.mxu1 %v151_v26  ;;  %v135_v42 = vld [vmem:[#allocation7 + $0xb8] sm:$0xff]  ;;  %v132_v43 = vld [vmem:[#allocation7 + $0xa0] sm:$0xff]  ;;  %v134_v44 = vld [vmem:[#allocation7 + $0xb0] sm:$0xff] }
  0x59   :  { %211 = vmatpush1.msra.mxu0 %v148_v27  ;;  %282 = vmatpush1.msra.mxu1 %v150_v28  ;;  %v129_v45 = vld [vmem:[#allocation7 + $0x88] sm:$0xff]  ;;  %v131_v46 = vld [vmem:[#allocation7 + $0x98] sm:$0xff]  ;;  %v128_v47 = vld [vmem:[#allocation7 + $0x80] sm:$0xff] }
  0x5a   :  { %212 = vmatprep.subr.mxu0 %v145_v29  ;;  %283 = vmatprep.subr.mxu1 %v147_v30  ;;  %v130_v48 = vld [vmem:[#allocation7 + $0x90] sm:$0xff]  ;;  %v125_v49 = vld [vmem:[#allocation7 + $0x68] sm:$0xff]  ;;  %v127_v50 = vld [vmem:[#allocation7 + $0x78] sm:$0xff] }
  0x5b   :  { %213 = vmatpush1.msra.mxu0 %v144_v31  ;;  %284 = vmatpush1.msra.mxu1 %v146_v32  ;;  %v124_v51 = vld [vmem:[#allocation7 + $0x60] sm:$0xff]  ;;  %v126_v52 = vld [vmem:[#allocation7 + $0x70] sm:$0xff]  ;;  %v121_v53 = vld [vmem:[#allocation7 + $0x48] sm:$0xff] }
  0x5c   :  { %214 = vmatprep.subr.mxu0 %v141_v33  ;;  %285 = vmatprep.subr.mxu1 %v143_v34  ;;  %v123_v54 = vld [vmem:[#allocation7 + $0x58] sm:$0xff]  ;;  %v120_v55 = vld [vmem:[#allocation7 + $0x40] sm:$0xff]  ;;  %v122_v56 = vld [vmem:[#allocation7 + $0x50] sm:$0xff] }
  0x5d   :  { %215 = vmatpush1.msra.mxu0 %v140_v35  ;;  %286 = vmatpush1.msra.mxu1 %v142_v36  ;;  %v117_v57 = vld [vmem:[#allocation7 + $0x28] sm:$0xff]  ;;  %v119_v58 = vld [vmem:[#allocation7 + $0x38] sm:$0xff]  ;;  %v116_v59 = vld [vmem:[#allocation7 + $0x20] sm:$0xff] }
  0x5e   :  { %216 = vmatprep.subr.mxu0 %v137_v37  ;;  %287 = vmatprep.subr.mxu1 %v139_v38  ;;  %v118_v60 = vld [vmem:[#allocation7 + $0x30] sm:$0xff]  ;;  %v113_v61 = vld [vmem:[#allocation7 + $0x8] sm:$0xff]  ;;  %v115_v62 = vld [vmem:[#allocation7 + $0x18] sm:$0xff] }
  0x5f   :  { %217 = vmatpush1.msra.mxu0 %v136_v39  ;;  %288 = vmatpush1.msra.mxu1 %v138_v40  ;;  %v112_v63 = vld [vmem:[#allocation7] sm:$0xff]  ;;  %v114_v1 = vld [vmem:[#allocation7 + $0x10] sm:$0xff]  ;;  %v582_v4 = vld [vmem:[#allocation10 + $0x168] sm:$0xff] }
  0x60   :  { %218 = vmatprep.subr.mxu0 %v133_v41  ;;  %289 = vmatprep.subr.mxu1 %v135_v42  ;;  %v111_v2 = vld [vmem:[#allocation2] sm:$0xff]  ;;  %v584_v5 = vld [vmem:[#allocation10 + $0x178] sm:$0xff]  ;;  %v581_v8 = vld [vmem:[#allocation10 + $0x160] sm:$0xff] }
  0x61   :  { %219 = vmatpush1.msra.mxu0 %v132_v43  ;;  %290 = vmatpush1.msra.mxu1 %v134_v44  ;;  %v583_v3 = vld [vmem:[#allocation10 + $0x170] sm:$0xff]  ;;  %v580_v6 = vld [vmem:[#allocation10 + $0x158] sm:$0xff]  ;;  %v577_v9 = vld [vmem:[#allocation10 + $0x140] sm:$0xff] }
  0x62   :  { %220 = vmatprep.subr.mxu0 %v129_v45  ;;  %291 = vmatprep.subr.mxu1 %v131_v46  ;;  %v579_v7 = vld [vmem:[#allocation10 + $0x150] sm:$0xff]  ;;  %v576_v10 = vld [vmem:[#allocation10 + $0x138] sm:$0xff]  ;;  %v578_v11 = vld [vmem:[#allocation10 + $0x148] sm:$0xff] }
  0x63   :  { %221 = vmatpush1.msra.mxu0 %v128_v47  ;;  %292 = vmatpush1.msra.mxu1 %v130_v48  ;;  %v574_v12 = vld [vmem:[#allocation10 + $0x128] sm:$0xff]  ;;  %v573_v13 = vld [vmem:[#allocation10 + $0x120] sm:$0xff]  ;;  %v575_v14 = vld [vmem:[#allocation10 + $0x130] sm:$0xff] }
  0x64   :  { %222 = vmatprep.subr.mxu0 %v125_v49  ;;  %293 = vmatprep.subr.mxu1 %v127_v50  ;;  %v571_v15 = vld [vmem:[#allocation10 + $0x110] sm:$0xff]  ;;  %v570_v16 = vld [vmem:[#allocation10 + $0x108] sm:$0xff]  ;;  %v572_v17 = vld [vmem:[#allocation10 + $0x118] sm:$0xff] }
  0x65   :  { %223 = vmatpush1.msra.mxu0 %v124_v51  ;;  %294 = vmatpush1.msra.mxu1 %v126_v52  ;;  %v568_v18 = vld [vmem:[#allocation10 + $0xf8] sm:$0xff]  ;;  %v567_v19 = vld [vmem:[#allocation10 + $0xf0] sm:$0xff]  ;;  %v569_v20 = vld [vmem:[#allocation10 + $0x100] sm:$0xff] }
  0x66   :  { %224 = vmatprep.subr.mxu0 %v121_v53  ;;  %295 = vmatprep.subr.mxu1 %v123_v54  ;;  %v565_v21 = vld [vmem:[#allocation10 + $0xe0] sm:$0xff]  ;;  %v564_v22 = vld [vmem:[#allocation10 + $0xd8] sm:$0xff]  ;;  %v566_v23 = vld [vmem:[#allocation10 + $0xe8] sm:$0xff] }
  0x67   :  { %225 = vmatpush1.msra.mxu0 %v120_v55  ;;  %296 = vmatpush1.msra.mxu1 %v122_v56  ;;  %v562_v24 = vld [vmem:[#allocation10 + $0xc8] sm:$0xff]  ;;  %v561_v25 = vld [vmem:[#allocation10 + $0xc0] sm:$0xff]  ;;  %v563_v26 = vld [vmem:[#allocation10 + $0xd0] sm:$0xff] }
  0x68   :  { %226 = vmatprep.subr.mxu0 %v117_v57  ;;  %297 = vmatprep.subr.mxu1 %v119_v58  ;;  %v559_v27 = vld [vmem:[#allocation10 + $0xb0] sm:$0xff]  ;;  %v558_v28 = vld [vmem:[#allocation10 + $0xa8] sm:$0xff]  ;;  %v560_v29 = vld [vmem:[#allocation10 + $0xb8] sm:$0xff] }
  0x69   :  { %227 = vmatpush1.msra.mxu0 %v116_v59  ;;  %298 = vmatpush1.msra.mxu1 %v118_v60  ;;  %v556_v30 = vld [vmem:[#allocation10 + $0x98] sm:$0xff]  ;;  %v555_v31 = vld [vmem:[#allocation10 + $0x90] sm:$0xff]  ;;  %v557_v32 = vld [vmem:[#allocation10 + $0xa0] sm:$0xff] }
  0x6a   :  { %228 = vmatprep.subr.mxu0 %v113_v61  ;;  %299 = vmatprep.subr.mxu1 %v115_v62  ;;  %v553_v33 = vld [vmem:[#allocation10 + $0x80] sm:$0xff]  ;;  %v552_v34 = vld [vmem:[#allocation10 + $0x78] sm:$0xff]  ;;  %v554_v35 = vld [vmem:[#allocation10 + $0x88] sm:$0xff] }
  0x6b   :  { %229 = vmatpush1.msra.mxu0 %v112_v63  ;;  %300 = vmatpush1.msra.mxu1 %v114_v1  ;;  %v550_v36 = vld [vmem:[#allocation10 + $0x68] sm:$0xff]  ;;  %v549_v37 = vld [vmem:[#allocation10 + $0x60] sm:$0xff]  ;;  %v551_v38 = vld [vmem:[#allocation10 + $0x70] sm:$0xff] }
  0x6c   :  { %263 = vmatmul.mubr.f32.vlgmr.msra.gmra.mxu0 %v111_v2  ;;  %334 = vmatmul.mubr.f32.vlgmr.msra.gmra.mxu1 %v111_v2  ;;  %v547_v39 = vld [vmem:[#allocation10 + $0x50] sm:$0xff]  ;;  %v546_v40 = vld [vmem:[#allocation10 + $0x48] sm:$0xff]  ;;  %v548_v41 = vld [vmem:[#allocation10 + $0x58] sm:$0xff] }
  0x6d   :  { %585 = vmatprep.subr.mxu0 %v583_v3  ;;  %1385 = vmatprep.subr.mxu1 %v1632_v0  ;;  %v544_v42 = vld [vmem:[#allocation10 + $0x38] sm:$0xff]  ;;  %v543_v43 = vld [vmem:[#allocation10 + $0x30] sm:$0xff]  ;;  %v545_v44 = vld [vmem:[#allocation10 + $0x40] sm:$0xff] }
  0x6e   :  { %586 = vmatpush1.msra.mxu0 %v582_v4  ;;  %1386 = vmatpush3.msra.mxu1 %v584_v5  ;;  %v541_v45 = vld [vmem:[#allocation10 + $0x20] sm:$0xff]  ;;  %v540_v46 = vld [vmem:[#allocation10 + $0x18] sm:$0xff]  ;;  %v542_v47 = vld [vmem:[#allocation10 + $0x28] sm:$0xff] }
  0x6f   :  { %587 = vmatprep.subr.mxu0 %v580_v6  ;;  %1387 = vmatprep.subr.mxu1 %v1632_v0  ;;  %v538_v48 = vld [vmem:[#allocation10 + $0x8] sm:$0xff]  ;;  %v537_v49 = vld [vmem:[#allocation10] sm:$0xff]  ;;  %v536_v50 = vld [vmem:[#allocation5] sm:$0xff] }
  0x70   :  { %588 = vmatpush1.msra.mxu0 %v579_v7  ;;  %1388 = vmatpush3.msra.mxu1 %v581_v8  ;;  %v539_v51 = vld [vmem:[#allocation10 + $0x10] sm:$0xff]  ;;  %v389_v54 = vld [vmem:[#allocation8 + $0x168] sm:$0xff]  ;;  %v387_v56 = vld [vmem:[#allocation8 + $0x158] sm:$0xff] }
  0x71   :  { %589 = vmatprep.subr.mxu0 %v577_v9  ;;  %1389 = vmatprep.subr.mxu1 %v1632_v0  ;;  %v390_v52 = vld [vmem:[#allocation8 + $0x170] sm:$0xff]  ;;  %v485_v55 = vld [vmem:[#allocation8 + $0x468] sm:$0xff]  ;;  %v483_v57 = vld [vmem:[#allocation8 + $0x458] sm:$0xff] }
  0x72   :  { %590 = vmatpush1.msra.mxu0 %v576_v10  ;;  %1390 = vmatpush3.msra.mxu1 %v578_v11  ;;  %v486_v53 = vld [vmem:[#allocation8 + $0x470] sm:$0xff]  ;;  %v384_v60 = vld [vmem:[#allocation8 + $0x140] sm:$0xff]  ;;  %v383_v62 = vld [vmem:[#allocation8 + $0x138] sm:$0xff] }
  0x73   :  { %591 = vmatprep.subr.mxu0 %v574_v12  ;;  %1391 = vmatprep.subr.mxu1 %v1632_v0  ;;  %v386_v58 = vld [vmem:[#allocation8 + $0x150] sm:$0xff]  ;;  %v480_v61 = vld [vmem:[#allocation8 + $0x440] sm:$0xff]  ;;  %v479_v63 = vld [vmem:[#allocation8 + $0x438] sm:$0xff] }
  0x74   :  { %592 = vmatpush1.msra.mxu0 %v573_v13  ;;  %1392 = vmatpush3.msra.mxu1 %v575_v14  ;;  %v482_v59 = vld [vmem:[#allocation8 + $0x450] sm:$0xff]  ;;  %v381_v1 = vld [vmem:[#allocation8 + $0x128] sm:$0xff]  ;;  %v380_v3 = vld [vmem:[#allocation8 + $0x120] sm:$0xff] }
  0x75   :  { %593 = vmatprep.subr.mxu0 %v571_v15  ;;  %1393 = vmatprep.subr.mxu1 %v1632_v0  ;;  %v477_v2 = vld [vmem:[#allocation8 + $0x428] sm:$0xff]  ;;  %v476_v4 = vld [vmem:[#allocation8 + $0x420] sm:$0xff]  ;;  %v378_v5 = vld [vmem:[#allocation8 + $0x110] sm:$0xff] }
  0x76   :  { %594 = vmatpush1.msra.mxu0 %v570_v16  ;;  %1394 = vmatpush3.msra.mxu1 %v572_v17  ;;  %v474_v6 = vld [vmem:[#allocation8 + $0x410] sm:$0xff]  ;;  %v377_v7 = vld [vmem:[#allocation8 + $0x108] sm:$0xff]  ;;  %v375_v9 = vld [vmem:[#allocation8 + $0xf8] sm:$0xff] }
  0x77   :  { %595 = vmatprep.subr.mxu0 %v568_v18  ;;  %1395 = vmatprep.subr.mxu1 %v1632_v0  ;;  %v473_v8 = vld [vmem:[#allocation8 + $0x408] sm:$0xff]  ;;  %v471_v10 = vld [vmem:[#allocation8 + $0x3f8] sm:$0xff]  ;;  %v374_v11 = vld [vmem:[#allocation8 + $0xf0] sm:$0xff] }
  0x78   :  { %596 = vmatpush1.msra.mxu0 %v567_v19  ;;  %1396 = vmatpush3.msra.mxu1 %v569_v20  ;;  %v470_v12 = vld [vmem:[#allocation8 + $0x3f0] sm:$0xff]  ;;  %v372_v13 = vld [vmem:[#allocation8 + $0xe0] sm:$0xff]  ;;  %v371_v15 = vld [vmem:[#allocation8 + $0xd8] sm:$0xff] }
  0x79   :  { %597 = vmatprep.subr.mxu0 %v565_v21  ;;  %1397 = vmatprep.subr.mxu1 %v1632_v0  ;;  %v468_v14 = vld [vmem:[#allocation8 + $0x3e0] sm:$0xff]  ;;  %v467_v16 = vld [vmem:[#allocation8 + $0x3d8] sm:$0xff]  ;;  %v369_v17 = vld [vmem:[#allocation8 + $0xc8] sm:$0xff] }
  0x7a   :  { %598 = vmatpush1.msra.mxu0 %v564_v22  ;;  %1398 = vmatpush3.msra.mxu1 %v566_v23  ;;  %v465_v18 = vld [vmem:[#allocation8 + $0x3c8] sm:$0xff]  ;;  %v368_v19 = vld [vmem:[#allocation8 + $0xc0] sm:$0xff]  ;;  %v366_v21 = vld [vmem:[#allocation8 + $0xb0] sm:$0xff] }
  0x7b   :  { %599 = vmatprep.subr.mxu0 %v562_v24  ;;  %1399 = vmatprep.subr.mxu1 %v1632_v0  ;;  %v464_v20 = vld [vmem:[#allocation8 + $0x3c0] sm:$0xff]  ;;  %v462_v22 = vld [vmem:[#allocation8 + $0x3b0] sm:$0xff]  ;;  %v365_v23 = vld [vmem:[#allocation8 + $0xa8] sm:$0xff] }
  0x7c   :  { %600 = vmatpush1.msra.mxu0 %v561_v25  ;;  %1400 = vmatpush3.msra.mxu1 %v563_v26  ;;  %v461_v24 = vld [vmem:[#allocation8 + $0x3a8] sm:$0xff]  ;;  %v363_v25 = vld [vmem:[#allocation8 + $0x98] sm:$0xff] }
  0x7d   :  { %601 = vmatprep.subr.mxu0 %v559_v27  ;;  %1401 = vmatprep.subr.mxu1 %v1632_v0  ;;  %v459_v26 = vld [vmem:[#allocation8 + $0x398] sm:$0xff]  ;;  %v362_v27 = vld [vmem:[#allocation8 + $0x90] sm:$0xff] }
  0x7e   :  { %602 = vmatpush1.msra.mxu0 %v558_v28  ;;  %1402 = vmatpush3.msra.mxu1 %v560_v29  ;;  %v458_v28 = vld [vmem:[#allocation8 + $0x390] sm:$0xff]  ;;  %v360_v29 = vld [vmem:[#allocation8 + $0x80] sm:$0xff] }
  0x7f   :  { %603 = vmatprep.subr.mxu0 %v556_v30  ;;  %1403 = vmatprep.subr.mxu1 %v1632_v0  ;;  %v456_v30 = vld [vmem:[#allocation8 + $0x380] sm:$0xff] }
  0x80   :  { %604 = vmatpush1.msra.mxu0 %v555_v31  ;;  %1404 = vmatpush3.msra.mxu1 %v557_v32  ;;  %v359_v31 = vld [vmem:[#allocation8 + $0x78] sm:$0xff] }
  0x81   :  { %605 = vmatprep.subr.mxu0 %v553_v33  ;;  %1405 = vmatprep.subr.mxu1 %v1632_v0  ;;  %v455_v32 = vld [vmem:[#allocation8 + $0x378] sm:$0xff]  ;;  %v357_v33 = vld [vmem:[#allocation8 + $0x68] sm:$0xff] }
  0x82   :  { %606 = vmatpush1.msra.mxu0 %v552_v34  ;;  %1406 = vmatpush3.msra.mxu1 %v554_v35  ;;  %v453_v34 = vld [vmem:[#allocation8 + $0x368] sm:$0xff]  ;;  %v356_v35 = vld [vmem:[#allocation8 + $0x60] sm:$0xff] }
  0x83   :  { %607 = vmatprep.subr.mxu0 %v550_v36  ;;  %1407 = vmatprep.subr.mxu1 %v1632_v0  ;;  %v452_v36 = vld [vmem:[#allocation8 + $0x360] sm:$0xff] }
  0x84   :  { %608 = vmatpush1.msra.mxu0 %v549_v37  ;;  %1408 = vmatpush3.msra.mxu1 %v551_v38  ;;  %v354_v37 = vld [vmem:[#allocation8 + $0x50] sm:$0xff] }
  0x85   :  { %609 = vmatprep.subr.mxu0 %v547_v39  ;;  %1409 = vmatprep.subr.mxu1 %v1632_v0  ;;  %v450_v38 = vld [vmem:[#allocation8 + $0x350] sm:$0xff]  ;;  %v353_v39 = vld [vmem:[#allocation8 + $0x48] sm:$0xff] }
  0x86   :  { %610 = vmatpush1.msra.mxu0 %v546_v40  ;;  %1410 = vmatpush3.msra.mxu1 %v548_v41  ;;  %v449_v40 = vld [vmem:[#allocation8 + $0x348] sm:$0xff]  ;;  %v351_v41 = vld [vmem:[#allocation8 + $0x38] sm:$0xff] }
  0x87   :  { %611 = vmatprep.subr.mxu0 %v544_v42  ;;  %1411 = vmatprep.subr.mxu1 %v1632_v0  ;;  %v447_v42 = vld [vmem:[#allocation8 + $0x338] sm:$0xff] }
  0x88   :  { %612 = vmatpush1.msra.mxu0 %v543_v43  ;;  %1412 = vmatpush3.msra.mxu1 %v545_v44  ;;  %v350_v43 = vld [vmem:[#allocation8 + $0x30] sm:$0xff] }
  0x89   :  { %613 = vmatprep.subr.mxu0 %v541_v45  ;;  %1413 = vmatprep.subr.mxu1 %v1632_v0  ;;  %v446_v44 = vld [vmem:[#allocation8 + $0x330] sm:$0xff]  ;;  %v348_v45 = vld [vmem:[#allocation8 + $0x20] sm:$0xff] }
  0x8a   :  { %614 = vmatpush1.msra.mxu0 %v540_v46  ;;  %1414 = vmatpush3.msra.mxu1 %v542_v47  ;;  %v444_v46 = vld [vmem:[#allocation8 + $0x320] sm:$0xff]  ;;  %v347_v47 = vld [vmem:[#allocation8 + $0x18] sm:$0xff] }
  0x8b   :  { %615 = vmatprep.subr.mxu0 %v538_v48  ;;  %649 = vmatprep.mubr.f32.mxu0 %v1632_v0  ;;  %v443_v48 = vld [vmem:[#allocation8 + $0x318] sm:$0xff] }
  0x8c   :  { %616 = vmatpush1.msra.mxu0 %v537_v49  ;;  %1415 = vmatprep.subr.mxu1 %v1632_v0  ;;  %v345_v49 = vld [vmem:[#allocation8 + $0x8] sm:$0xff] }
  0x8d   :  { %650 = vmatmul.mubr.f32.vlgmr.msra.gmra.mxu0 %v536_v50  ;;  %1416 = vmatpush3.msra.mxu1 %v539_v51  ;;  %v344_v51 = vld [vmem:[#allocation8] sm:$0xff] }
  0x8e   :  { %1417 = vmatprep.mubr.msk.f32.mxu1 %vm1633_vm0, %v1632_v0  ;;  %726 = vmatprep.subr.mxu0 %v390_v52  ;;  %v440_v52 = vld [vmem:[#allocation8 + $0x300] sm:$0xff] }
  0x8f   :  { %797 = vmatprep.subr.mxu1 %v486_v53  ;;  %1418 = vmatmul.mubr.f32.vlgmr.msra.gmra.mxu1 %v536_v50  ;;  %v441_v50 = vld [vmem:[#allocation8 + $0x308] sm:$0xff]  ;;  %v438_v53 = vld [vmem:[#allocation8 + $0x2f0] sm:$0xff] }
  0x90   :  { %727 = vmatpush1.msra.mxu0 %v389_v54  ;;  %798 = vmatpush1.msra.mxu1 %v485_v55  ;;  %v534_v54 = vld [vmem:[#allocation8 + $0x5f0] sm:$0xff]  ;;  %v437_v55 = vld [vmem:[#allocation8 + $0x2e8] sm:$0xff] }
  0x91   :  { %728 = vmatprep.subr.mxu0 %v387_v56  ;;  %799 = vmatprep.subr.mxu1 %v483_v57  ;;  %v533_v56 = vld [vmem:[#allocation8 + $0x5e8] sm:$0xff]  ;;  %v435_v57 = vld [vmem:[#allocation8 + $0x2d8] sm:$0xff] }
  0x92   :  { %729 = vmatpush1.msra.mxu0 %v386_v58  ;;  %800 = vmatpush1.msra.mxu1 %v482_v59  ;;  %v531_v58 = vld [vmem:[#allocation8 + $0x5d8] sm:$0xff]  ;;  %v434_v59 = vld [vmem:[#allocation8 + $0x2d0] sm:$0xff] }
  0x93   :  { %730 = vmatprep.subr.mxu0 %v384_v60  ;;  %801 = vmatprep.subr.mxu1 %v480_v61  ;;  %v530_v60 = vld [vmem:[#allocation8 + $0x5d0] sm:$0xff]  ;;  %v432_v61 = vld [vmem:[#allocation8 + $0x2c0] sm:$0xff] }
  0x94   :  { %731 = vmatpush1.msra.mxu0 %v383_v62  ;;  %802 = vmatpush1.msra.mxu1 %v479_v63  ;;  %v528_v62 = vld [vmem:[#allocation8 + $0x5c0] sm:$0xff]  ;;  %v431_v63 = vld [vmem:[#allocation8 + $0x2b8] sm:$0xff] }
  0x95   :  { %732 = vmatprep.subr.mxu0 %v381_v1  ;;  %803 = vmatprep.subr.mxu1 %v477_v2  ;;  %v527_v1 = vld [vmem:[#allocation8 + $0x5b8] sm:$0xff]  ;;  %v429_v2 = vld [vmem:[#allocation8 + $0x2a8] sm:$0xff] }
  0x96   :  { %733 = vmatpush1.msra.mxu0 %v380_v3  ;;  %804 = vmatpush1.msra.mxu1 %v476_v4  ;;  %v525_v3 = vld [vmem:[#allocation8 + $0x5a8] sm:$0xff]  ;;  %v428_v4 = vld [vmem:[#allocation8 + $0x2a0] sm:$0xff] }
  0x97   :  { %734 = vmatprep.subr.mxu0 %v378_v5  ;;  %805 = vmatprep.subr.mxu1 %v474_v6  ;;  %v524_v5 = vld [vmem:[#allocation8 + $0x5a0] sm:$0xff]  ;;  %v426_v6 = vld [vmem:[#allocation8 + $0x290] sm:$0xff] }
  0x98   :  { %735 = vmatpush1.msra.mxu0 %v377_v7  ;;  %806 = vmatpush1.msra.mxu1 %v473_v8  ;;  %v522_v7 = vld [vmem:[#allocation8 + $0x590] sm:$0xff]  ;;  %v425_v8 = vld [vmem:[#allocation8 + $0x288] sm:$0xff] }
  0x99   :  { %736 = vmatprep.subr.mxu0 %v375_v9  ;;  %807 = vmatprep.subr.mxu1 %v471_v10  ;;  %v521_v9 = vld [vmem:[#allocation8 + $0x588] sm:$0xff]  ;;  %v423_v10 = vld [vmem:[#allocation8 + $0x278] sm:$0xff] }
  0x9a   :  { %737 = vmatpush1.msra.mxu0 %v374_v11  ;;  %808 = vmatpush1.msra.mxu1 %v470_v12  ;;  %v519_v11 = vld [vmem:[#allocation8 + $0x578] sm:$0xff]  ;;  %v422_v12 = vld [vmem:[#allocation8 + $0x270] sm:$0xff] }
  0x9b   :  { %738 = vmatprep.subr.mxu0 %v372_v13  ;;  %809 = vmatprep.subr.mxu1 %v468_v14  ;;  %v518_v13 = vld [vmem:[#allocation8 + $0x570] sm:$0xff]  ;;  %v420_v14 = vld [vmem:[#allocation8 + $0x260] sm:$0xff] }
  0x9c   :  { %739 = vmatpush1.msra.mxu0 %v371_v15  ;;  %810 = vmatpush1.msra.mxu1 %v467_v16  ;;  %v516_v15 = vld [vmem:[#allocation8 + $0x560] sm:$0xff]  ;;  %v419_v16 = vld [vmem:[#allocation8 + $0x258] sm:$0xff] }
  0x9d   :  { %740 = vmatprep.subr.mxu0 %v369_v17  ;;  %811 = vmatprep.subr.mxu1 %v465_v18  ;;  %v515_v17 = vld [vmem:[#allocation8 + $0x558] sm:$0xff]  ;;  %v417_v18 = vld [vmem:[#allocation8 + $0x248] sm:$0xff] }
  0x9e   :  { %741 = vmatpush1.msra.mxu0 %v368_v19  ;;  %812 = vmatpush1.msra.mxu1 %v464_v20  ;;  %v513_v19 = vld [vmem:[#allocation8 + $0x548] sm:$0xff]  ;;  %v416_v20 = vld [vmem:[#allocation8 + $0x240] sm:$0xff] }
  0x9f   :  { %742 = vmatprep.subr.mxu0 %v366_v21  ;;  %813 = vmatprep.subr.mxu1 %v462_v22  ;;  %v512_v21 = vld [vmem:[#allocation8 + $0x540] sm:$0xff]  ;;  %v414_v22 = vld [vmem:[#allocation8 + $0x230] sm:$0xff] }
  0xa0   :  { %743 = vmatpush1.msra.mxu0 %v365_v23  ;;  %814 = vmatpush1.msra.mxu1 %v461_v24  ;;  %v510_v23 = vld [vmem:[#allocation8 + $0x530] sm:$0xff]  ;;  %v413_v24 = vld [vmem:[#allocation8 + $0x228] sm:$0xff] }
  0xa1   :  { %744 = vmatprep.subr.mxu0 %v363_v25  ;;  %815 = vmatprep.subr.mxu1 %v459_v26  ;;  %v509_v25 = vld [vmem:[#allocation8 + $0x528] sm:$0xff]  ;;  %v411_v26 = vld [vmem:[#allocation8 + $0x218] sm:$0xff] }
  0xa2   :  { %745 = vmatpush1.msra.mxu0 %v362_v27  ;;  %816 = vmatpush1.msra.mxu1 %v458_v28  ;;  %v507_v27 = vld [vmem:[#allocation8 + $0x518] sm:$0xff]  ;;  %v410_v28 = vld [vmem:[#allocation8 + $0x210] sm:$0xff] }
  0xa3   :  { %746 = vmatprep.subr.mxu0 %v360_v29  ;;  %817 = vmatprep.subr.mxu1 %v456_v30  ;;  %v506_v29 = vld [vmem:[#allocation8 + $0x510] sm:$0xff]  ;;  %v408_v30 = vld [vmem:[#allocation8 + $0x200] sm:$0xff] }
  0xa4   :  { %747 = vmatpush1.msra.mxu0 %v359_v31  ;;  %818 = vmatpush1.msra.mxu1 %v455_v32  ;;  %v504_v31 = vld [vmem:[#allocation8 + $0x500] sm:$0xff]  ;;  %v407_v32 = vld [vmem:[#allocation8 + $0x1f8] sm:$0xff] }
  0xa5   :  { %748 = vmatprep.subr.mxu0 %v357_v33  ;;  %819 = vmatprep.subr.mxu1 %v453_v34  ;;  %v503_v33 = vld [vmem:[#allocation8 + $0x4f8] sm:$0xff]  ;;  %v405_v34 = vld [vmem:[#allocation8 + $0x1e8] sm:$0xff] }
  0xa6   :  { %749 = vmatpush1.msra.mxu0 %v356_v35  ;;  %820 = vmatpush1.msra.mxu1 %v452_v36  ;;  %v501_v35 = vld [vmem:[#allocation8 + $0x4e8] sm:$0xff]  ;;  %v404_v36 = vld [vmem:[#allocation8 + $0x1e0] sm:$0xff] }
  0xa7   :  { %750 = vmatprep.subr.mxu0 %v354_v37  ;;  %821 = vmatprep.subr.mxu1 %v450_v38  ;;  %v500_v37 = vld [vmem:[#allocation8 + $0x4e0] sm:$0xff]  ;;  %v402_v38 = vld [vmem:[#allocation8 + $0x1d0] sm:$0xff] }
  0xa8   :  { %751 = vmatpush1.msra.mxu0 %v353_v39  ;;  %822 = vmatpush1.msra.mxu1 %v449_v40  ;;  %v498_v39 = vld [vmem:[#allocation8 + $0x4d0] sm:$0xff]  ;;  %v401_v40 = vld [vmem:[#allocation8 + $0x1c8] sm:$0xff] }
  0xa9   :  { %752 = vmatprep.subr.mxu0 %v351_v41  ;;  %823 = vmatprep.subr.mxu1 %v447_v42  ;;  %v497_v41 = vld [vmem:[#allocation8 + $0x4c8] sm:$0xff]  ;;  %v399_v42 = vld [vmem:[#allocation8 + $0x1b8] sm:$0xff] }
  0xaa   :  { %753 = vmatpush1.msra.mxu0 %v350_v43  ;;  %824 = vmatpush1.msra.mxu1 %v446_v44  ;;  %v495_v43 = vld [vmem:[#allocation8 + $0x4b8] sm:$0xff]  ;;  %v398_v44 = vld [vmem:[#allocation8 + $0x1b0] sm:$0xff] }
  0xab   :  { %754 = vmatprep.subr.mxu0 %v348_v45  ;;  %825 = vmatprep.subr.mxu1 %v444_v46  ;;  %v494_v45 = vld [vmem:[#allocation8 + $0x4b0] sm:$0xff]  ;;  %v396_v46 = vld [vmem:[#allocation8 + $0x1a0] sm:$0xff] }
  0xac   :  { %755 = vmatpush1.msra.mxu0 %v347_v47  ;;  %826 = vmatpush1.msra.mxu1 %v443_v48  ;;  %v492_v47 = vld [vmem:[#allocation8 + $0x4a0] sm:$0xff]  ;;  %v395_v48 = vld [vmem:[#allocation8 + $0x198] sm:$0xff] }
  0xad   :  { %756 = vmatprep.subr.mxu0 %v345_v49  ;;  %827 = vmatprep.subr.mxu1 %v441_v50  ;;  %v491_v49 = vld [vmem:[#allocation8 + $0x498] sm:$0xff]  ;;  %v393_v50 = vld [vmem:[#allocation8 + $0x188] sm:$0xff] }
  0xae   :  { %757 = vmatpush1.msra.mxu0 %v344_v51  ;;  %828 = vmatpush1.msra.mxu1 %v440_v52  ;;  %v489_v51 = vld [vmem:[#allocation8 + $0x488] sm:$0xff]  ;;  %v392_v52 = vld [vmem:[#allocation8 + $0x180] sm:$0xff] }
  0xaf   :  { %758 = vmatprep.subr.mxu0 %v438_v53  ;;  %829 = vmatprep.subr.mxu1 %v534_v54  ;;  %v488_v53 = vld [vmem:[#allocation8 + $0x480] sm:$0xff]  ;;  %v439_v54 = vld [vmem:[#allocation8 + $0x2f8] sm:$0xff] }
  0xb0   :  { %759 = vmatpush2.msra.mxu0 %v437_v55  ;;  %830 = vmatpush2.msra.mxu1 %v533_v56  ;;  %v535_v55 = vld [vmem:[#allocation8 + $0x5f8] sm:$0xff]  ;;  %v178_v56 = vlaneseq }
  0xb1   :  { %760 = vmatprep.subr.mxu0 %v435_v57  ;;  %831 = vmatprep.subr.mxu1 %v531_v58 }
  0xb2   :  { %761 = vmatpush2.msra.mxu0 %v434_v59  ;;  %832 = vmatpush2.msra.mxu1 %v530_v60  ;;  %v1730_v57 = vshrl.u32 %v178_v56, 7  ;;  %v176_v60 = vld [vmem:[%s1798_s3] sm:$0xf]  ;;  %v361_v56 = vld [vmem:[#allocation8 + $0x88] sm:$0xff] }
  0xb3   :  { %762 = vmatprep.subr.mxu0 %v432_v61  ;;  %833 = vmatprep.subr.mxu1 %v528_v62 }
  0xb4   :  { %763 = vmatpush2.msra.mxu0 %v431_v63  ;;  %834 = vmatpush2.msra.mxu1 %v527_v1  ;;  %v188_v58 = vsub.s32 2, %v1730_v57  ;;  %v180_v59 = vsub.s32 0, %v1730_v57  ;;  %v184_v61 = vsub.s32 1, %v1730_v57  ;;  %v192_v62 = vsub.s32 3, %v1730_v57 }
  0xb5   :  { %764 = vmatprep.subr.mxu0 %v429_v2  ;;  %835 = vmatprep.subr.mxu1 %v525_v3 }
  0xb6   :  { %765 = vmatpush2.msra.mxu0 %v428_v4  ;;  %836 = vmatpush2.msra.mxu1 %v524_v5  ;;  %v189_v63 = vrot.slane %v176_v60, %v188_v58  ;;  %v181_v1 = vrot.slane %v176_v60, %v180_v59  ;;  %v185_v2 = vrot.slane %v176_v60, %v184_v61 }
  0xb7   :  { %766 = vmatprep.subr.mxu0 %v426_v6  ;;  %837 = vmatprep.subr.mxu1 %v522_v7  ;;  %v193_v3 = vrot.slane %v176_v60, %v192_v62  ;;  %v457_v60 = vld [vmem:[#allocation8 + $0x388] sm:$0xff]  ;;  %v406_v62 = vld [vmem:[#allocation8 + $0x1f0] sm:$0xff] }
  0xb8   :  { %767 = vmatpush2.msra.mxu0 %v425_v8  ;;  %838 = vmatpush2.msra.mxu1 %v521_v9 }
  0xb9   :  { %768 = vmatprep.subr.mxu0 %v423_v10  ;;  %839 = vmatprep.subr.mxu1 %v519_v11 }
  0xba   :  { %769 = vmatpush2.msra.mxu0 %v422_v12  ;;  %840 = vmatpush2.msra.mxu1 %v518_v13 }
  0xbb   :  { %770 = vmatprep.subr.mxu0 %v420_v14  ;;  %841 = vmatprep.subr.mxu1 %v516_v15 }
  0xbc   :  { %771 = vmatpush2.msra.mxu0 %v419_v16  ;;  %842 = vmatpush2.msra.mxu1 %v515_v17  ;;  %v391_v16 = vld [vmem:[#allocation8 + $0x178] sm:$0xff] }
  0xbd   :  { %772 = vmatprep.subr.mxu0 %v417_v18  ;;  %843 = vmatprep.subr.mxu1 %v513_v19  ;;  %v487_v17 = vld [vmem:[#allocation8 + $0x478] sm:$0xff]  ;;  %v436_v18 = vld [vmem:[#allocation8 + $0x2e0] sm:$0xff] }
  0xbe   :  { %773 = vmatpush2.msra.mxu0 %v416_v20  ;;  %844 = vmatpush2.msra.mxu1 %v512_v21  ;;  %v532_v19 = vld [vmem:[#allocation8 + $0x5e0] sm:$0xff] }
  0xbf   :  { %774 = vmatprep.subr.mxu0 %v414_v22  ;;  %845 = vmatprep.subr.mxu1 %v510_v23  ;;  %v388_v20 = vld [vmem:[#allocation8 + $0x160] sm:$0xff]  ;;  %v433_v22 = vld [vmem:[#allocation8 + $0x2c8] sm:$0xff] }
  0xc0   :  { %775 = vmatpush2.msra.mxu0 %v413_v24  ;;  %846 = vmatpush2.msra.mxu1 %v509_v25  ;;  %v484_v21 = vld [vmem:[#allocation8 + $0x460] sm:$0xff]  ;;  %v529_v23 = vld [vmem:[#allocation8 + $0x5c8] sm:$0xff] }
  0xc1   :  { %776 = vmatprep.subr.mxu0 %v411_v26  ;;  %847 = vmatprep.subr.mxu1 %v507_v27  ;;  %v385_v24 = vld [vmem:[#allocation8 + $0x148] sm:$0xff]  ;;  %v430_v26 = vld [vmem:[#allocation8 + $0x2b0] sm:$0xff] }
  0xc2   :  { %777 = vmatpush2.msra.mxu0 %v410_v28  ;;  %848 = vmatpush2.msra.mxu1 %v506_v29  ;;  %v481_v25 = vld [vmem:[#allocation8 + $0x448] sm:$0xff]  ;;  %v526_v27 = vld [vmem:[#allocation8 + $0x5b0] sm:$0xff] }
  0xc3   :  { %778 = vmatprep.subr.mxu0 %v408_v30  ;;  %849 = vmatprep.subr.mxu1 %v504_v31  ;;  %v382_v28 = vld [vmem:[#allocation8 + $0x130] sm:$0xff]  ;;  %v427_v30 = vld [vmem:[#allocation8 + $0x298] sm:$0xff] }
  0xc4   :  { %779 = vmatpush2.msra.mxu0 %v407_v32  ;;  %850 = vmatpush2.msra.mxu1 %v503_v33  ;;  %v478_v29 = vld [vmem:[#allocation8 + $0x430] sm:$0xff]  ;;  %v523_v31 = vld [vmem:[#allocation8 + $0x598] sm:$0xff] }
  0xc5   :  { %780 = vmatprep.subr.mxu0 %v405_v34  ;;  %851 = vmatprep.subr.mxu1 %v501_v35  ;;  %v379_v32 = vld [vmem:[#allocation8 + $0x118] sm:$0xff]  ;;  %v424_v34 = vld [vmem:[#allocation8 + $0x280] sm:$0xff] }
  0xc6   :  { %781 = vmatpush2.msra.mxu0 %v404_v36  ;;  %852 = vmatpush2.msra.mxu1 %v500_v37  ;;  %v475_v33 = vld [vmem:[#allocation8 + $0x418] sm:$0xff]  ;;  %v520_v35 = vld [vmem:[#allocation8 + $0x580] sm:$0xff] }
  0xc7   :  { %782 = vmatprep.subr.mxu0 %v402_v38  ;;  %853 = vmatprep.subr.mxu1 %v498_v39  ;;  %v376_v36 = vld [vmem:[#allocation8 + $0x100] sm:$0xff]  ;;  %v421_v38 = vld [vmem:[#allocation8 + $0x268] sm:$0xff] }
  0xc8   :  { %783 = vmatpush2.msra.mxu0 %v401_v40  ;;  %854 = vmatpush2.msra.mxu1 %v497_v41  ;;  %v472_v37 = vld [vmem:[#allocation8 + $0x400] sm:$0xff]  ;;  %v517_v39 = vld [vmem:[#allocation8 + $0x568] sm:$0xff] }
  0xc9   :  { %784 = vmatprep.subr.mxu0 %v399_v42  ;;  %855 = vmatprep.subr.mxu1 %v495_v43  ;;  %v373_v40 = vld [vmem:[#allocation8 + $0xe8] sm:$0xff]  ;;  %v418_v42 = vld [vmem:[#allocation8 + $0x250] sm:$0xff] }
  0xca   :  { %785 = vmatpush2.msra.mxu0 %v398_v44  ;;  %856 = vmatpush2.msra.mxu1 %v494_v45  ;;  %v469_v41 = vld [vmem:[#allocation8 + $0x3e8] sm:$0xff]  ;;  %v514_v43 = vld [vmem:[#allocation8 + $0x550] sm:$0xff] }
  0xcb   :  { %786 = vmatprep.subr.mxu0 %v396_v46  ;;  %857 = vmatprep.subr.mxu1 %v492_v47  ;;  %v370_v44 = vld [vmem:[#allocation8 + $0xd0] sm:$0xff]  ;;  %v415_v46 = vld [vmem:[#allocation8 + $0x238] sm:$0xff] }
  0xcc   :  { %787 = vmatpush2.msra.mxu0 %v395_v48  ;;  %858 = vmatpush2.msra.mxu1 %v491_v49  ;;  %v466_v45 = vld [vmem:[#allocation8 + $0x3d0] sm:$0xff]  ;;  %v511_v47 = vld [vmem:[#allocation8 + $0x538] sm:$0xff] }
  0xcd   :  { %788 = vmatprep.subr.mxu0 %v393_v50  ;;  %859 = vmatprep.subr.mxu1 %v489_v51  ;;  %v367_v48 = vld [vmem:[#allocation8 + $0xb8] sm:$0xff]  ;;  %v412_v50 = vld [vmem:[#allocation8 + $0x220] sm:$0xff] }
  0xce   :  { %789 = vmatpush2.msra.mxu0 %v392_v52  ;;  %860 = vmatpush2.msra.mxu1 %v488_v53  ;;  %v463_v49 = vld [vmem:[#allocation8 + $0x3b8] sm:$0xff]  ;;  %v508_v51 = vld [vmem:[#allocation8 + $0x520] sm:$0xff] }
  0xcf   :  { %1263 = vmatprep.subr.mxu0 %v439_v54  ;;  %1298 = vmatprep.subr.mxu1 %v535_v55  ;;  %v364_v52 = vld [vmem:[#allocation8 + $0xa0] sm:$0xff]  ;;  %v409_v54 = vld [vmem:[#allocation8 + $0x208] sm:$0xff] }
  0xd0   :  { %v460_v53 = vld [vmem:[#allocation8 + $0x3a0] sm:$0xff]  ;;  %v505_v55 = vld [vmem:[#allocation8 + $0x508] sm:$0xff] }
 0x12c   :  { %v264_v4 = vpop.f32.mrf.mxu0  ;;  %v335_v5 = vpop.f32.mrf.mxu1 }
 0x12d   :  { %v1745_v6 = vadd.f32 %v335_v5, %v189_v63  ;;  %v1747_v7 = vadd.f32 %v264_v4, %v181_v1  ;;  %v502_v63 = vld [vmem:[#allocation8 + $0x4f0] sm:$0xff]  ;;  %v499_v4 = vld [vmem:[#allocation8 + $0x4d8] sm:$0xff] }
 0x12e   :  { %v266_v8 = vpop.f32.mrf.mxu0  ;;  %v337_v9 = vpop.f32.mrf.mxu1  ;;  %v358_v1 = vld [vmem:[#allocation8 + $0x70] sm:$0xff]  ;;  %v355_v5 = vld [vmem:[#allocation8 + $0x58] sm:$0xff] }
 0x12f   :  { %v267_v10 = vadd.f32 %v266_v8, %v185_v2  ;;  %v338_v11 = vadd.f32 %v337_v9, %v193_v3  ;;  %v342_v12 = vmax.f32 %v1745_v6, 0.0  ;;  %v340_v15 = vmax.f32 %v1747_v7, 0.0  ;;  %v454_v2 = vld [vmem:[#allocation8 + $0x370] sm:$0xff]  ;;  %v403_v3 = vld [vmem:[#allocation8 + $0x1d8] sm:$0xff]  ;;  %v400_v9 = vld [vmem:[#allocation8 + $0x1c0] sm:$0xff] }
 0x130   :  { %v451_v8 = vld [vmem:[#allocation8 + $0x358] sm:$0xff]  ;;  %v1043_v7 = vld [vmem:[#allocation11 + $0x60] sm:$0xff] }
 0x131   :  { %v341_v13 = vmax.f32 %v267_v10, 0.0  ;;  %v343_v14 = vmax.f32 %v338_v11, 0.0  ;;  %v496_v10 = vld [vmem:[#allocation8 + $0x4c0] sm:$0xff]  ;;  %v1042_v6 = vld [vmem:[#allocation11 + $0x58] sm:$0xff] }
 0x132   :  { %v352_v11 = vld [vmem:[#allocation8 + $0x40] sm:$0xff] }
 0x133   :  { %790 = vmatprep.mubr.f32.mxu0 %v341_v13  ;;  %861 = vmatprep.mubr.f32.mxu1 %v343_v14 }
 0x134   :  { %791 = vmatmul.mubr.f32.vlgmr.msra.gmra.mxu0 %v340_v15  ;;  %862 = vmatmul.mubr.f32.vlgmr.msra.gmra.mxu1 %v342_v12 }
 0x135   :  { %1264 = vmatpush3.msra.mxu0 %v391_v16  ;;  %1299 = vmatpush3.msra.mxu1 %v487_v17  ;;  %v493_v16 = vld [vmem:[#allocation8 + $0x4a8] sm:$0xff] }
 0x136   :  { %1265 = vmatprep.subr.mxu0 %v436_v18  ;;  %932 = vmatprep.mubr.f32.mxu0 %v341_v13  ;;  %v448_v13 = vld [vmem:[#allocation8 + $0x340] sm:$0xff]  ;;  %v349_v17 = vld [vmem:[#allocation8 + $0x28] sm:$0xff] }
 0x137   :  { %1300 = vmatprep.subr.mxu1 %v532_v19  ;;  %1002 = vmatprep.mubr.f32.mxu1 %v343_v14  ;;  %v397_v14 = vld [vmem:[#allocation8 + $0x1a8] sm:$0xff] }
 0x138   :  { %1266 = vmatpush3.msra.mxu0 %v388_v20  ;;  %1301 = vmatpush3.msra.mxu1 %v484_v21  ;;  %v445_v18 = vld [vmem:[#allocation8 + $0x328] sm:$0xff]  ;;  %v394_v20 = vld [vmem:[#allocation8 + $0x190] sm:$0xff] }
 0x139   :  { %1267 = vmatprep.subr.mxu0 %v433_v22  ;;  %1302 = vmatprep.subr.mxu1 %v529_v23  ;;  %v490_v21 = vld [vmem:[#allocation8 + $0x490] sm:$0xff] }
 0x13a   :  { %1268 = vmatpush3.msra.mxu0 %v385_v24  ;;  %1303 = vmatpush3.msra.mxu1 %v481_v25  ;;  %v346_v22 = vld [vmem:[#allocation8 + $0x10] sm:$0xff]  ;;  %v1062_v25 = vld [vmem:[#allocation11 + $0xf8] sm:$0xff] }
 0x13b   :  { %1269 = vmatprep.subr.mxu0 %v430_v26  ;;  %1304 = vmatprep.subr.mxu1 %v526_v27  ;;  %v442_v23 = vld [vmem:[#allocation8 + $0x310] sm:$0xff]  ;;  %v1046_v26 = vld [vmem:[#allocation11 + $0x78] sm:$0xff] }
 0x13c   :  { %1270 = vmatpush3.msra.mxu0 %v382_v28  ;;  %1305 = vmatpush3.msra.mxu1 %v478_v29  ;;  %v1061_v27 = vld [vmem:[#allocation11 + $0xf0] sm:$0xff]  ;;  %v1060_v29 = vld [vmem:[#allocation11 + $0xe8] sm:$0xff] }
 0x13d   :  { %1271 = vmatprep.subr.mxu0 %v427_v30  ;;  %1306 = vmatprep.subr.mxu1 %v523_v31  ;;  %v1045_v28 = vld [vmem:[#allocation11 + $0x70] sm:$0xff]  ;;  %v1044_v30 = vld [vmem:[#allocation11 + $0x68] sm:$0xff]  ;;  %v1059_v31 = vld [vmem:[#allocation11 + $0xe0] sm:$0xff] }
 0x13e   :  { %1272 = vmatpush3.msra.mxu0 %v379_v32  ;;  %1307 = vmatpush3.msra.mxu1 %v475_v33  ;;  %v1041_v32 = vld [vmem:[#allocation11 + $0x50] sm:$0xff]  ;;  %v1056_v33 = vld [vmem:[#allocation11 + $0xc8] sm:$0xff] }
 0x13f   :  { %1273 = vmatprep.subr.mxu0 %v424_v34  ;;  %1308 = vmatprep.subr.mxu1 %v520_v35  ;;  %v1040_v34 = vld [vmem:[#allocation11 + $0x48] sm:$0xff]  ;;  %v1055_v35 = vld [vmem:[#allocation11 + $0xc0] sm:$0xff] }
 0x140   :  { %1274 = vmatpush3.msra.mxu0 %v376_v36  ;;  %1309 = vmatpush3.msra.mxu1 %v472_v37  ;;  %v1039_v36 = vld [vmem:[#allocation11 + $0x40] sm:$0xff]  ;;  %v1054_v37 = vld [vmem:[#allocation11 + $0xb8] sm:$0xff] }
 0x141   :  { %1275 = vmatprep.subr.mxu0 %v421_v38  ;;  %1310 = vmatprep.subr.mxu1 %v517_v39  ;;  %v1038_v38 = vld [vmem:[#allocation11 + $0x38] sm:$0xff]  ;;  %v1053_v39 = vld [vmem:[#allocation11 + $0xb0] sm:$0xff] }
 0x142   :  { %1276 = vmatpush3.msra.mxu0 %v373_v40  ;;  %1311 = vmatpush3.msra.mxu1 %v469_v41  ;;  %v1037_v40 = vld [vmem:[#allocation11 + $0x30] sm:$0xff]  ;;  %v1052_v41 = vld [vmem:[#allocation11 + $0xa8] sm:$0xff] }
 0x143   :  { %1277 = vmatprep.subr.mxu0 %v418_v42  ;;  %1312 = vmatprep.subr.mxu1 %v514_v43  ;;  %v1036_v42 = vld [vmem:[#allocation11 + $0x28] sm:$0xff]  ;;  %v1051_v43 = vld [vmem:[#allocation11 + $0xa0] sm:$0xff] }
 0x144   :  { %1278 = vmatpush3.msra.mxu0 %v370_v44  ;;  %1313 = vmatpush3.msra.mxu1 %v466_v45  ;;  %v1035_v44 = vld [vmem:[#allocation11 + $0x20] sm:$0xff]  ;;  %v1050_v45 = vld [vmem:[#allocation11 + $0x98] sm:$0xff] }
 0x145   :  { %1279 = vmatprep.subr.mxu0 %v415_v46  ;;  %1314 = vmatprep.subr.mxu1 %v511_v47  ;;  %v1034_v46 = vld [vmem:[#allocation11 + $0x18] sm:$0xff]  ;;  %v1049_v47 = vld [vmem:[#allocation11 + $0x90] sm:$0xff] }
 0x146   :  { %1280 = vmatpush3.msra.mxu0 %v367_v48  ;;  %1315 = vmatpush3.msra.mxu1 %v463_v49  ;;  %v1033_v48 = vld [vmem:[#allocation11 + $0x10] sm:$0xff]  ;;  %v1048_v49 = vld [vmem:[#allocation11 + $0x88] sm:$0xff] }
 0x147   :  { %1281 = vmatprep.subr.mxu0 %v412_v50  ;;  %1316 = vmatprep.subr.mxu1 %v508_v51  ;;  %v1032_v50 = vld [vmem:[#allocation11 + $0x8] sm:$0xff]  ;;  %v1047_v51 = vld [vmem:[#allocation11 + $0x80] sm:$0xff] }
 0x148   :  { %1282 = vmatpush3.msra.mxu0 %v364_v52  ;;  %1317 = vmatpush3.msra.mxu1 %v460_v53  ;;  %v1031_v52 = vld [vmem:[#allocation11] sm:$0xff]  ;;  %v1078_v53 = vld [vmem:[#allocation11 + $0x178] sm:$0xff] }
 0x149   :  { %1283 = vmatprep.subr.mxu0 %v409_v54  ;;  %1318 = vmatprep.subr.mxu1 %v505_v55  ;;  %v1077_v54 = vld [vmem:[#allocation11 + $0x170] sm:$0xff]  ;;  %v1076_v55 = vld [vmem:[#allocation11 + $0x168] sm:$0xff] }
 0x14a   :  { %1284 = vmatpush3.msra.mxu0 %v361_v56  ;;  %1319 = vmatpush3.msra.mxu1 %v457_v60  ;;  %v1075_v56 = vld [vmem:[#allocation11 + $0x160] sm:$0xff]  ;;  %v1074_v60 = vld [vmem:[#allocation11 + $0x158] sm:$0xff] }
 0x14b   :  { %1285 = vmatprep.subr.mxu0 %v406_v62  ;;  %1320 = vmatprep.subr.mxu1 %v502_v63  ;;  %v1073_v62 = vld [vmem:[#allocation11 + $0x150] sm:$0xff]  ;;  %v1072_v63 = vld [vmem:[#allocation11 + $0x148] sm:$0xff] }
 0x14c   :  { %1286 = vmatpush3.msra.mxu0 %v358_v1  ;;  %1321 = vmatpush3.msra.mxu1 %v454_v2  ;;  %v1071_v1 = vld [vmem:[#allocation11 + $0x140] sm:$0xff]  ;;  %v1070_v2 = vld [vmem:[#allocation11 + $0x138] sm:$0xff] }
 0x14d   :  { %1287 = vmatprep.subr.mxu0 %v403_v3  ;;  %1322 = vmatprep.subr.mxu1 %v499_v4  ;;  %v1069_v3 = vld [vmem:[#allocation11 + $0x130] sm:$0xff]  ;;  %v1068_v4 = vld [vmem:[#allocation11 + $0x128] sm:$0xff] }
 0x14e   :  { %1288 = vmatpush3.msra.mxu0 %v355_v5  ;;  %1323 = vmatpush3.msra.mxu1 %v451_v8  ;;  %v1067_v5 = vld [vmem:[#allocation11 + $0x120] sm:$0xff]  ;;  %v1066_v8 = vld [vmem:[#allocation11 + $0x118] sm:$0xff] }
 0x14f   :  { %1289 = vmatprep.subr.mxu0 %v400_v9  ;;  %1324 = vmatprep.subr.mxu1 %v496_v10  ;;  %v1755_v19 = vpop.f32.mrf.mxu1  ;;  %v1065_v9 = vld [vmem:[#allocation11 + $0x110] sm:$0xff]  ;;  %v1064_v10 = vld [vmem:[#allocation11 + $0x108] sm:$0xff] }
 0x150   :  { %1290 = vmatpush3.msra.mxu0 %v352_v11  ;;  %1325 = vmatpush3.msra.mxu1 %v448_v13  ;;  %v1063_v11 = vld [vmem:[#allocation11 + $0x100] sm:$0xff]  ;;  %v651_v13 = vpop.f32.mrf.mxu0 }
 0x151   :  { %1291 = vmatprep.subr.mxu0 %v397_v14  ;;  %1326 = vmatprep.subr.mxu1 %v493_v16  ;;  %v1419_v24 = vpop.f32.mrf.mxu1  ;;  %v1008_v16 = vld [vmem:[%s1801_s6] sm:$0x7] }
 0x152   :  { %1292 = vmatpush3.msra.mxu0 %v349_v17  ;;  %1327 = vmatpush3.msra.mxu1 %v445_v18  ;;  %v653_v14 = vpop.f32.mrf.mxu0 }
 0x153   :  { %1293 = vmatprep.subr.mxu0 %v394_v20  ;;  %1328 = vmatprep.subr.mxu1 %v490_v21  ;;  %v1013_v21 = vrot.slane %v1008_v16, %v180_v59 }
 0x154   :  { %1294 = vmatpush3.msra.mxu0 %v346_v22  ;;  %1329 = vmatpush3.msra.mxu1 %v442_v23 }
 0x155   :  { %933 = vmatmul.mubr.f32.vlgmr.msra.gmra.mxu0 %v340_v15  ;;  %1003 = vmatmul.mubr.f32.vlgmr.msra.gmra.mxu1 %v342_v12  ;;  %v1058_v15 = vld [vmem:[#allocation11 + $0xd8] sm:$0xff]  ;;  %v1057_v12 = vld [vmem:[#allocation11 + $0xd0] sm:$0xff] }
 0x156   :  { %1333 = vmatprep.subr.mxu0 %v1062_v25  ;;  %1420 = vmatprep.subr.mxu1 %v1632_v0 }
 0x157   :  { %1334 = vmatpush3.msra.mxu0 %v1046_v26  ;;  %1452 = vmatprep.mubr.msk.f32.mxu1 %vm1633_vm0, %v1632_v0 }
 0x158   :  { %1335 = vmatprep.subr.mxu0 %v1061_v27  ;;  %1421 = vmatpush3.msra.mxu1 %v1078_v53 }
 0x159   :  { %1336 = vmatpush3.msra.mxu0 %v1045_v28  ;;  %1422 = vmatprep.subr.mxu1 %v1632_v0 }
 0x15a   :  { %1337 = vmatprep.subr.mxu0 %v1060_v29  ;;  %1423 = vmatpush3.msra.mxu1 %v1077_v54 }
 0x15b   :  { %1338 = vmatpush3.msra.mxu0 %v1044_v30  ;;  %1424 = vmatprep.subr.mxu1 %v1632_v0 }
 0x15c   :  { %1339 = vmatprep.subr.mxu0 %v1059_v31  ;;  %1425 = vmatpush3.msra.mxu1 %v1076_v55 }
 0x15d   :  { %1340 = vmatpush3.msra.mxu0 %v1043_v7  ;;  %1426 = vmatprep.subr.mxu1 %v1632_v0 }
 0x15e   :  { %1341 = vmatprep.subr.mxu0 %v1058_v15  ;;  %1427 = vmatpush3.msra.mxu1 %v1075_v56 }
 0x15f   :  { %1342 = vmatpush3.msra.mxu0 %v1042_v6  ;;  %1428 = vmatprep.subr.mxu1 %v1632_v0 }
 0x160   :  { %1343 = vmatprep.subr.mxu0 %v1057_v12  ;;  %1429 = vmatpush3.msra.mxu1 %v1074_v60 }
 0x161   :  { %1344 = vmatpush3.msra.mxu0 %v1041_v32  ;;  %1430 = vmatprep.subr.mxu1 %v1632_v0 }
 0x162   :  { %1345 = vmatprep.subr.mxu0 %v1056_v33  ;;  %1431 = vmatpush3.msra.mxu1 %v1073_v62  ;;  %v1021_v33 = vrot.slane %v1008_v16, %v188_v58 }
 0x163   :  { %1346 = vmatpush3.msra.mxu0 %v1040_v34  ;;  %1432 = vmatprep.subr.mxu1 %v1632_v0 }
 0x164   :  { %1347 = vmatprep.subr.mxu0 %v1055_v35  ;;  %1433 = vmatpush3.msra.mxu1 %v1072_v63 }
 0x165   :  { %1348 = vmatpush3.msra.mxu0 %v1039_v36  ;;  %1434 = vmatprep.subr.mxu1 %v1632_v0 }
 0x166   :  { %1349 = vmatprep.subr.mxu0 %v1054_v37  ;;  %1435 = vmatpush3.msra.mxu1 %v1071_v1 }
 0x167   :  { %1350 = vmatpush3.msra.mxu0 %v1038_v38  ;;  %1436 = vmatprep.subr.mxu1 %v1632_v0 }
 0x168   :  { %1351 = vmatprep.subr.mxu0 %v1053_v39  ;;  %1437 = vmatpush3.msra.mxu1 %v1070_v2  ;;  %v1245_v39 = vld [vmem:[%s1803_s8] ss:$0 sm:$0xff] }
 0x169   :  { %1352 = vmatpush3.msra.mxu0 %v1037_v40  ;;  %1438 = vmatprep.subr.mxu1 %v1632_v0 }
 0x16a   :  { %1353 = vmatprep.subr.mxu0 %v1052_v41  ;;  %1439 = vmatpush3.msra.mxu1 %v1069_v3 }
 0x16b   :  { %1354 = vmatpush3.msra.mxu0 %v1036_v42  ;;  %1440 = vmatprep.subr.mxu1 %v1632_v0 }
 0x16c   :  { %1355 = vmatprep.subr.mxu0 %v1051_v43  ;;  %1441 = vmatpush3.msra.mxu1 %v1068_v4 }
 0x16d   :  { %1356 = vmatpush3.msra.mxu0 %v1035_v44  ;;  %1442 = vmatprep.subr.mxu1 %v1632_v0 }
 0x16e   :  { %1357 = vmatprep.subr.mxu0 %v1050_v45  ;;  %1443 = vmatpush3.msra.mxu1 %v1067_v5 }
 0x16f   :  { %1358 = vmatpush3.msra.mxu0 %v1034_v46  ;;  %1444 = vmatprep.subr.mxu1 %v1632_v0 }
 0x170   :  { %1359 = vmatprep.subr.mxu0 %v1049_v47  ;;  %1445 = vmatpush3.msra.mxu1 %v1066_v8 }
 0x171   :  { %1360 = vmatpush3.msra.mxu0 %v1033_v48  ;;  %1446 = vmatprep.subr.mxu1 %v1632_v0 }
 0x172   :  { %1361 = vmatprep.subr.mxu0 %v1048_v49  ;;  %1447 = vmatpush3.msra.mxu1 %v1065_v9 }
 0x173   :  { %1362 = vmatpush3.msra.mxu0 %v1032_v50  ;;  %1448 = vmatprep.subr.mxu1 %v1632_v0 }
 0x174   :  { %1363 = vmatprep.subr.mxu0 %v1047_v51  ;;  %1449 = vmatpush3.msra.mxu1 %v1064_v10 }
 0x175   :  { %1364 = vmatpush3.msra.mxu0 %v1031_v52  ;;  %1450 = vmatprep.subr.mxu1 %v1632_v0  ;;  %v1017_v0 = vrot.slane %v1008_v16, %v184_v61 }
 0x176   :  { %1451 = vmatpush3.msra.mxu1 %v1063_v11 }
 0x1f4   :  { %v792_v17 = vpop.f32.mrf.mxu0  ;;  %v863_v18 = vpop.f32.mrf.mxu1 }
 0x1f5   :  { %v793_v20 = vadd.f32 %v792_v17, %v651_v13 }
 0x1f6   :  { %v794_v22 = vpop.f32.mrf.mxu0  ;;  %v865_v25 = vpop.f32.mrf.mxu1 }
 0x1f7   :  { %v864_v23 = vadd.f32 %v863_v18, %v793_v20  ;;  %v795_v24 = vadd.f32 %v794_v22, %v653_v14 }
 0x1f9   :  { %v866_v26 = vadd.f32 %v865_v25, %v795_v24  ;;  %v1025_v27 = vadd.f32 %v1013_v21, %v864_v23 }
 0x1fb   :  { %v1026_v28 = vadd.f32 %v1017_v0, %v866_v26  ;;  %v1028_v30 = vmax.f32 %v1025_v27, 0.0 }
 0x1fd   :  { %v1029_v29 = vmax.f32 %v1026_v28, 0.0 }
 0x1ff   :  { %1150 = vmatprep.mubr.f32.mxu0 %v1029_v29 }
 0x200   :  { %1151 = vmatmul.mubr.f32.vlgmr.msra.gmra.mxu0 %v1028_v30 }
 0x215   :  { %v1295_v31 = vpop.f32.mrf.mxu0  ;;  %v1330_v7 = vpop.f32.mrf.mxu1 }
 0x217   :  { %v1296_v15 = vpop.f32.mrf.mxu0  ;;  %v1331_v6 = vpop.f32.mrf.mxu1 }
 0x218   :  { %v1297_v12 = vadd.f32 %v1296_v15, %v1295_v31  ;;  %v1332_v32 = vadd.f32 %v1331_v6, %v1330_v7 }
 0x21a   :  { %v935_v59 = vadd.f32 %v1297_v12, %v1755_v19 }
 0x21c   :  { %v1005_v61 = vadd.f32 %v1332_v32, %v935_v59 }
 0x21e   :  { %v1027_v34 = vadd.f32 %v1021_v33, %v1005_v61 }
 0x220   :  { %v1030_v35 = vmax.f32 %v1027_v34, 0.0 }
 0x222   :  { %1453 = vmatmul.mubr.f32.vlgmr.msra.gmra.mxu1 %v1030_v35 }
 0x2c0   :  { %v1365_v36 = vpop.f32.mrf.mxu0 }
 0x2c2   :  { %v1366_v37 = vpop.f32.mrf.mxu0 }
 0x2c3   :  { %v1367_v38 = vadd.f32 %v1366_v37, %v1365_v36 }
 0x2c5   :  { %v1153_v40 = vadd.f32 %v1367_v38, %v1245_v39 }
 0x2e2   :  { %v1222_v41 = vpop.f32.mrf.mxu1 }
 0x2e3   :  { %v1223_v19 = vadd.f32 %v1222_v41, %v1153_v40 }
 0x2e4   :  { %v1454_v42 = vpop.f32.mrf.mxu1 }
 0x2e5   :  { %1226 = vst [vmem:[#allocation13] sm:$0xff] %v1223_v19 }
 0x2e6   :  { %1601 = shalt.err (!%p1598_p6)
}
 0x2e7   :  { %1236 = dma.vmem_to_hbm [thread:$0]  %s1234_s23, 128, %s1804_s9, [#allocation4]  }
 0x2e8   :  { %1618 = dma.done.wait [#allocation4], 128  }
 0x2e9   :  { %1619 = vsyncadd [#allocation4], 4294967168 }
 0x2ea   :  { %1240 = vsyncpa [#allocation3], 1 }
 0x2eb   :  { %1241 = vsyncpa [#allocation6], 1 }
 0x2ec   :  { %1242 = vsyncpa [#allocation9], 1 }
 0x2ed   :  { %1243 = vsyncpa [#allocation12], 1 }
 0x2ee   :  { %1244 = vsyncpa [#allocation4], 1 }

</bundles_post_ra>
